<compile_context>
chip_gen: v5e
topology: v5e:2x2
jax: 0.10.0
libtpu: 0.0.40
codegen_flags: <defaults>
</compile_context>

<pallas_src>
import functools

import jax
import jax.numpy as jnp
from jax.experimental import pallas as pl
from jax.experimental.pallas import tpu as pltpu


def _round_up(a, b):
    return (a + b - 1) // b * b


def _mlp_kernel_acc(x_ref, w_gu_ref, w_down_ref, o_ref, acc_ref, *, ti):
    """Multi-step reduction variant (nk > 1).

    x_ref:      (TM, H)       token tile (native dtype, e.g. bf16)
    w_gu_ref:   (H, 2*ti)     contiguous [gate|up] slab for this I-tile
    w_down_ref: (ti, H)       c_proj slab for this I-tile (contiguous rows)
    o_ref:      (TM, H)       output tile (resident across the I axis)
    acc_ref:    (TM, H) f32   VMEM accumulator scratch
    """
    k = pl.program_id(1)

    @pl.when(k == 0)
    def _():
        acc_ref[...] = jnp.zeros_like(acc_ref)

    x = x_ref[...]
    # One fused MXU call for gate and up; f32 accumulation.
    gu = jnp.dot(x, w_gu_ref[...], preferred_element_type=jnp.float32)  # (TM, 2*ti)
    gate = gu[:, :ti]
    up = gu[:, ti:]
    # SiluAndMul in f32 (EUP sigmoid + VPU muls); cast only for the down matmul.
    h = (gate * jax.nn.sigmoid(gate) * up).astype(w_down_ref.dtype)

    acc_ref[...] += jnp.dot(h, w_down_ref[...], preferred_element_type=jnp.float32)

    @pl.when(k == pl.num_programs(1) - 1)
    def _():
        o_ref[...] = acc_ref[...].astype(o_ref.dtype)


def _mlp_kernel_single(x_ref, w_gu_ref, w_down_ref, o_ref, *, ti):
    """Single-reduction-step variant (ti == I): no accumulator scratch needed."""
    x = x_ref[...]
    gu = jnp.dot(x, w_gu_ref[...], preferred_element_type=jnp.float32)
    gate = gu[:, :ti]
    up = gu[:, ti:]
    h = (gate * jax.nn.sigmoid(gate) * up).astype(w_down_ref.dtype)
    o_ref[...] = jnp.dot(
        h, w_down_ref[...], preferred_element_type=jnp.float32
    ).astype(o_ref.dtype)


def prepare_qwen_mlp_weights(w_gate_up, w_c_proj, *, ti=512):
    """One-time layout transform from torch nn.Linear ([out, in]) layout.

    w_gate_up: (2*I, H)  torch layout (gate rows first, then up rows)
    w_c_proj:  (H, I)    torch layout

    Returns:
      w_gu:   (I//ti, H, 2*ti)  per-I-tile contiguous slabs, columns [gate|up]
      w_down: (I, H)            [in, out]; each (ti, H) block is contiguous in HBM

    ti guidance: v6e can use 1024 (128 MiB VMEM); v7x keep 256-512 (64 MiB VMEM);
    v5e 256-512. Must be a multiple of 128 (or the full I). Do this ONCE at
    weight-load time, not per forward call.
    """
    two_i, H = w_gate_up.shape
    I = two_i // 2
    ti = min(ti, I)
    assert I % ti == 0, "intermediate_size must be divisible by ti"
    assert ti == I or ti % 128 == 0, "ti must be a multiple of 128 (or the full I)"
    nk = I // ti

    gate_t = w_gate_up[:I, :].T  # (H, I)
    up_t = w_gate_up[I:, :].T    # (H, I)
    gate_b = gate_t.reshape(H, nk, ti).transpose(1, 0, 2)  # (nk, H, ti)
    up_b = up_t.reshape(H, nk, ti).transpose(1, 0, 2)      # (nk, H, ti)
    w_gu = jnp.concatenate([gate_b, up_b], axis=-1)        # (nk, H, 2*ti)
    w_down = w_c_proj.T                                     # (I, H)
    return w_gu, w_down


@functools.partial(jax.jit, static_argnames=("tm",))
def qwen_mlp(x, w_gu, w_down, *, tm=512):
    """Fused QWenMLP forward: (silu(x@Wg) * (x@Wu)) @ Wd.

    x:      (T, H)          activations (flatten any leading dims into T first)
    w_gu:   (nk, H, 2*ti)   from prepare_qwen_mlp_weights
    w_down: (I, H)          from prepare_qwen_mlp_weights

    tm: token tile. Arithmetic intensity of the weight stream ~ tm FLOP/byte, so for
    prefill use tm >= 256 (v5e, 128-granular) and tm >= 512 (v6e/v7x, 256-granular)
    to stay MXU-bound. Small T is handled by a single sublane-rounded tile.
    """
    T, H = x.shape
    nk, H2, two_ti = w_gu.shape
    assert H2 == H, "hidden size mismatch between x and w_gu"
    ti = two_ti // 2
    I = nk * ti
    assert w_down.shape == (I, H), "w_down shape mismatch"

    act_item = jnp.dtype(x.dtype).itemsize
    w_item = jnp.dtype(w_gu.dtype).itemsize
    sub = max(8, 32 // act_item)  # sublane packing: 8 (f32), 16 (bf16), 32 (int8)

    # Token tiling (pad T to the tile grid; round tiny T up to the sublane size).
    if T <= tm:
        tm_eff = _round_up(T, sub)
        # TODO(synk): on v7x (2 TCs), split a single medium-T tile into two token
        # tiles (or shard the k axis across cores) so the second core isn't idle
        # for decode-sized batches.
    else:
        tm_eff = _round_up(tm, sub)
    Tp = _round_up(T, tm_eff)
    x_p = x if Tp == T else jnp.pad(x, ((0, Tp - T), (0, 0)))

    grid = (Tp // tm_eff, nk)  # reduction (I) axis innermost

    # ---- cost estimate -------------------------------------------------------
    flops = 6 * Tp * H * I                 # 2*T*H*(2I) gate_up + 2*T*I*H down proj
    transcendentals = Tp * I               # one sigmoid per gate element
    bytes_accessed = int(
        Tp * H * act_item                  # x read
        + grid[0] * (3 * H * I) * w_item   # gate/up/down weights streamed per token tile
        + Tp * H * act_item                # output write
    )

    # ---- VMEM budgeting ------------------------------------------------------
    # Double-buffered pipeline tiles:
    pipe_bytes = 2 * (
        tm_eff * H * act_item              # x tile
        + 2 * H * ti * w_item              # fused gate|up slab
        + ti * H * w_item                  # down-proj slab
        + tm_eff * H * act_item            # output tile
    )
    # Accumulator scratch (only in the multi-step variant) + in-kernel f32
    # temporaries (fused gate|up result, h, down-proj matmul result).
    scratch_bytes = tm_eff * H * 4 if nk > 1 else 0
    temps_bytes = 4 * tm_eff * ti * 4 + tm_eff * H * 4
    vmem_needed = pipe_bytes + scratch_bytes + temps_bytes

    # Physical VMEM ceiling with headroom (v5e/v6e: 128 MiB, v7x: 64 MiB per TC).
    try:
        vmem_cap = int(pltpu.get_tpu_info().vmem_capacity_bytes)
    except Exception:
        vmem_cap = 64 * 1024 * 1024  # conservative fallback = v7x physical VMEM
    vmem_ceiling = vmem_cap - 8 * 1024 * 1024
    # Always set the limit (v5e's default scoped limit is only 16 MiB). If the
    # request exceeds the ceiling, shrink ti (re-prepare weights) or tm instead.
    vmem_limit = min(max(int(vmem_needed * 5 // 4), 32 * 1024 * 1024), vmem_ceiling)

    compiler_params = pltpu.CompilerParams(
        dimension_semantics=("parallel", "arbitrary"),
        vmem_limit_bytes=vmem_limit,
    )

    in_specs = [
        pl.BlockSpec((tm_eff, H), lambda m, k: (m, 0)),
        pl.BlockSpec((None, H, 2 * ti), lambda m, k: (k, 0, 0)),  # contiguous slab
        pl.BlockSpec((ti, H), lambda m, k: (k, 0)),               # contiguous slab
    ]
    out_spec = pl.BlockSpec((tm_eff, H), lambda m, k: (m, 0))

    if nk > 1:
        kernel = functools.partial(_mlp_kernel_acc, ti=ti)
        scratch = [pltpu.VMEM((tm_eff, H), jnp.float32)]
    else:
        kernel = functools.partial(_mlp_kernel_single, ti=ti)
        scratch = []

    out = pl.pallas_call(
        kernel,
        out_shape=jax.ShapeDtypeStruct((Tp, H), x.dtype),
        grid_spec=pltpu.PrefetchScalarGridSpec(
            num_scalar_prefetch=0,
            grid=grid,
            in_specs=in_specs,
            out_specs=out_spec,
            scratch_shapes=scratch,
        ),
        compiler_params=compiler_params,
        cost_estimate=pl.CostEstimate(
            flops=flops,
            transcendentals=transcendentals,
            bytes_accessed=bytes_accessed,
        ),
    )(x_p, w_gu, w_down)

    return out if Tp == T else out[:T]


def qwen_mlp_ref(x, w_gate_up, w_c_proj):
    """Pure-JAX reference matching the PyTorch forward (torch weight layout)."""
    hi = jax.lax.Precision.HIGHEST
    gate_up = jnp.dot(x, w_gate_up.T, precision=hi)
    d = gate_up.shape[-1] // 2
    gate, up = gate_up[..., :d], gate_up[..., d:]
    h = jax.nn.silu(gate) * up
    return jnp.dot(h, w_c_proj.T, precision=hi)


# TODO(synk): tensor-parallel sharding / RowParallelLinear all-reduce is not modeled;
# this is the single-device (or per-shard) MLP kernel.

if __name__ == "__main__":
    # Small-but-tileable shapes: tokens=64, hidden=256, intermediate=512.
    T, H, I = 64, 256, 512

    key = jax.random.PRNGKey(0)
    kx, kg, kc = jax.random.split(key, 3)

    x_f32 = jax.random.normal(kx, (T, H), dtype=jnp.float32)
    # torch nn.Linear layout: [out_features, in_features]
    w_gate_up_f32 = jax.random.normal(kg, (2 * I, H), dtype=jnp.float32) * 0.05
    w_c_proj_f32 = jax.random.normal(kc, (H, I), dtype=jnp.float32) * 0.05

    ref = qwen_mlp_ref(x_f32, w_gate_up_f32, w_c_proj_f32)

    # --- f32, multi-step reduction path (2 token tiles x 2 k-steps) ---
    w_gu, w_down = prepare_qwen_mlp_weights(w_gate_up_f32, w_c_proj_f32, ti=256)
    out_f32 = jax.block_until_ready(qwen_mlp(x_f32, w_gu, w_down, tm=32))
    assert out_f32.shape == (T, H)
    assert jnp.allclose(out_f32, ref, atol=2e-2, rtol=2e-2), "f32 mismatch vs reference"

    # --- f32, single-step path (ti == I -> no accumulator scratch) ---
    w_gu_1, w_down_1 = prepare_qwen_mlp_weights(w_gate_up_f32, w_c_proj_f32, ti=512)
    out_single = jax.block_until_ready(qwen_mlp(x_f32, w_gu_1, w_down_1))
    assert jnp.allclose(out_single, ref, atol=2e-2, rtol=2e-2), "single-step mismatch"

    # --- bf16 path (production dtype: bf16 MXU operands, f32 accumulation) ---
    x_bf = x_f32.astype(jnp.bfloat16)
    w_gu_bf, w_down_bf = prepare_qwen_mlp_weights(
        w_gate_up_f32.astype(jnp.bfloat16),
        w_c_proj_f32.astype(jnp.bfloat16),
        ti=256,
    )
    out_bf = jax.block_until_ready(qwen_mlp(x_bf, w_gu_bf, w_down_bf, tm=32))
    max_err = jnp.max(jnp.abs(out_bf.astype(jnp.float32) - ref))
    assert max_err < 6e-2, f"bf16 mismatch vs reference: {max_err}"

    print("KERNEL_OK")
</pallas_src>

<mosaic_0001>
module attributes {stable_mosaic.version = 11 : i64} {
  func.func @_mlp_kernel_acc(%arg0: i32, %arg1: i32, %arg2: memref<32x256xf32, #tpu.memory_space<vmem>>, %arg3: memref<1x256x512xf32, #tpu.memory_space<vmem>>, %arg4: memref<256x256xf32, #tpu.memory_space<vmem>>, %arg5: memref<32x256xf32, #tpu.memory_space<vmem>>, %arg6: memref<32x256xf32, #tpu.memory_space<vmem>>) attributes {dimension_semantics = [#tpu.dimension_semantics<parallel>, #tpu.dimension_semantics<arbitrary>], iteration_bounds = array<i64: 2, 2>, scalar_prefetch = 0 : i64, scratch_operands = 1 : i64, tpu.core_type = #tpu.core_type<tc>, window_params = [{transform_indices = @transform_0, window_bounds = array<i64: 32, 256>}, {transform_indices = @transform_1, window_bounds = array<i64: 1, 256, 512>}, {transform_indices = @transform_2, window_bounds = array<i64: 256, 256>}, {transform_indices = @transform_3, window_bounds = array<i64: 32, 256>}]} {
    %c0_i32 = arith.constant 0 : i32
    %0 = arith.cmpi eq, %arg1, %c0_i32 : i32
    %1 = arith.extui %0 : i1 to i32
    %c0_i32_0 = arith.constant 0 : i32
    %2 = arith.cmpi ne, %1, %c0_i32_0 : i32
    scf.if %2 {
      %cst_14 = arith.constant 0.000000e+00 : f32
      %24 = vector.broadcast %cst_14 : f32 to vector<32x256xf32>
      %c0_15 = arith.constant 0 : index
      %c0_16 = arith.constant 0 : index
      %25 = vector.load %arg6[%c0_15, %c0_16] : memref<32x256xf32, #tpu.memory_space<vmem>>, vector<32x256xf32>
      tpu.vector_store %arg6[%c0_15, %c0_16], %24 {strides = array<i32>} : memref<32x256xf32, #tpu.memory_space<vmem>>, vector<32x256xf32>,
    } else {
    }
    %c0 = arith.constant 0 : index
    %c0_1 = arith.constant 0 : index
    %3 = vector.load %arg2[%c0, %c0_1] : memref<32x256xf32, #tpu.memory_space<vmem>>, vector<32x256xf32>
    %c0_2 = arith.constant 0 : index
    %c0_3 = arith.constant 0 : index
    %c0_4 = arith.constant 0 : index
    %4 = vector.load %arg3[%c0_2, %c0_3, %c0_4] : memref<1x256x512xf32, #tpu.memory_space<vmem>>, vector<1x256x512xf32>
    %5 = vector.shape_cast %4 : vector<1x256x512xf32> to vector<256x512xf32>
    %cst = arith.constant dense<0.000000e+00> : vector<32x512xf32>
    %6 = tpu.matmul %3, %5, %cst {dimension_numbers = #tpu.dot_dimension_numbers<[1], [0], [0], [1], [0, 0, 1, 1], [], []>} : vector<32x256xf32>, vector<256x512xf32>, vector<32x512xf32> -> vector<32x512xf32>
    %7 = vector.extract_strided_slice %6 {offsets = [0, 0], sizes = [32, 256], strides = [1, 1]} : vector<32x512xf32> to vector<32x256xf32>
    %8 = vector.extract_strided_slice %6 {offsets = [0, 256], sizes = [32, 256], strides = [1, 1]} : vector<32x512xf32> to vector<32x256xf32>
    %9 = arith.negf %7 : vector<32x256xf32>
    %10 = math.exp %9 : vector<32x256xf32>
    %cst_5 = arith.constant 1.000000e+00 : f32
    %11 = vector.broadcast %cst_5 : f32 to vector<32x256xf32>
    %12 = arith.addf %11, %10 : vector<32x256xf32>
    %13 = arith.divf %11, %12 : vector<32x256xf32>
    %14 = arith.mulf %7, %13 : vector<32x256xf32>
    %15 = arith.mulf %14, %8 : vector<32x256xf32>
    %c0_6 = arith.constant 0 : index
    %c0_7 = arith.constant 0 : index
    %16 = vector.load %arg6[%c0_6, %c0_7] : memref<32x256xf32, #tpu.memory_space<vmem>>, vector<32x256xf32>
    %c0_8 = arith.constant 0 : index
    %c0_9 = arith.constant 0 : index
    %17 = vector.load %arg4[%c0_8, %c0_9] : memref<256x256xf32, #tpu.memory_space<vmem>>, vector<256x256xf32>
    %cst_10 = arith.constant dense<0.000000e+00> : vector<32x256xf32>
    %18 = tpu.matmul %15, %17, %cst_10 {dimension_numbers = #tpu.dot_dimension_numbers<[1], [0], [0], [1], [0, 0, 1, 1], [], []>} : vector<32x256xf32>, vector<256x256xf32>, vector<32x256xf32> -> vector<32x256xf32>
    %19 = arith.addf %16, %18 : vector<32x256xf32>
    %c0_11 = arith.constant 0 : index
    %c0_12 = arith.constant 0 : index
    %20 = vector.load %arg6[%c0_11, %c0_12] : memref<32x256xf32, #tpu.memory_space<vmem>>, vector<32x256xf32>
    tpu.vector_store %arg6[%c0_11, %c0_12], %19 {strides = array<i32>} : memref<32x256xf32, #tpu.memory_space<vmem>>, vector<32x256xf32>,
    %c1_i32 = arith.constant 1 : i32
    %21 = arith.cmpi eq, %arg1, %c1_i32 : i32
    %22 = arith.extui %21 : i1 to i32
    %c0_i32_13 = arith.constant 0 : i32
    %23 = arith.cmpi ne, %22, %c0_i32_13 : i32
    scf.if %23 {
      %c0_14 = arith.constant 0 : index
      %c0_15 = arith.constant 0 : index
      %24 = vector.load %arg6[%c0_14, %c0_15] : memref<32x256xf32, #tpu.memory_space<vmem>>, vector<32x256xf32>
      %c0_16 = arith.constant 0 : index
      %c0_17 = arith.constant 0 : index
      %25 = vector.load %arg5[%c0_16, %c0_17] : memref<32x256xf32, #tpu.memory_space<vmem>>, vector<32x256xf32>
      tpu.vector_store %arg5[%c0_16, %c0_17], %24 {strides = array<i32>} : memref<32x256xf32, #tpu.memory_space<vmem>>, vector<32x256xf32>,
    } else {
    }
    return
  }
  func.func @transform_0(%arg0: i32, %arg1: i32) -> (i32, i32) {
    %c0_i32 = arith.constant 0 : i32
    %c0_i32_0 = arith.constant 0 : i32
    return %arg0, %c0_i32 : i32, i32
  }
  func.func @transform_1(%arg0: i32, %arg1: i32) -> (i32, i32, i32) {
    %c0_i32 = arith.constant 0 : i32
    %c0_i32_0 = arith.constant 0 : i32
    %c0_i32_1 = arith.constant 0 : i32
    return %arg1, %c0_i32, %c0_i32_0 : i32, i32, i32
  }
  func.func @transform_2(%arg0: i32, %arg1: i32) -> (i32, i32) {
    %c0_i32 = arith.constant 0 : i32
    %c0_i32_0 = arith.constant 0 : i32
    return %arg1, %c0_i32 : i32, i32
  }
  func.func @transform_3(%arg0: i32, %arg1: i32) -> (i32, i32) {
    %c0_i32 = arith.constant 0 : i32
    %c0_i32_0 = arith.constant 0 : i32
    return %arg0, %c0_i32 : i32, i32
  }
}

</mosaic_0001>

<bundles_post_ra>
// kernel: qwen_mlp.1
= control target key start
LH: loop header
LB: loop body
LE: loop exit
PB: predicated region body
PF: predicated region fallthrough
CT: control target
= control target key end

     0   :  { %s2327_s0 = inlined_call_operand.hbm [shape: f32[64,256], index: 0, kind: input, shape index: {}]   ;;  %s2328_s1 = inlined_call_operand.hbm [shape: f32[2,256,512], index: 1, kind: input, shape index: {}]   ;;  %s2329_s2 = inlined_call_operand.hbm [shape: f32[512,256], index: 2, kind: input, shape index: {}]   ;;  %s2330_s3 = inlined_call_operand.hbm [shape: f32[64,256], index: 3, kind: output, shape index: {}]  }
   0x1   :  { %2341 = sst [smem:[#allocation23_spill]] %s2328_s1 }
   0x2   :  { %2342 = sst [smem:[#allocation24_spill]] %s2330_s3 }
   0x3   :  { %8 = vsyncpa [#allocation4], 0 }
   0x4   :  { %10 = vsyncpa [#allocation4 + $0x1], 0 }
   0x5   :  { %11 = vsyncpa [#allocation7], 0 }
   0x6   :  { %13 = vsyncpa [#allocation7 + $0x1], 0 }
   0x7   :  { %14 = vsyncpa [#allocation5], 0 }
   0x8   :  { %16 = vsyncpa [#allocation5 + $0x1], 0  ;;  %s1644_s12 = smov 0   ;;  %s1646_s13 = smov 0  }
   0x9   :  { %s1648_s14 = smov 0   ;;  %s1650_s15 = smov 0  }
   0xa   :  { %s1652_s16 = smov 0   ;;  %s1654_s17 = smov 0  }
   0xb   :  { %s1656_s18 = smov 0   ;;  %s1658_s19 = smov 0  }
   0xc   :  { %s1660_s20 = smov 0   ;;  %s1662_s21 = smov 0  }
   0xd   :  { %s1664_s22 = smov 0  }
   0xe LB: > { %2343 = sst [smem:[#allocation13_spill]] %s1583_s14  ;;  %s1698_s23 = sadd.s32 4294967295, %s1615_s22   ;;  %s1615_s22 = sphi %s1664_s22, %s22_s22   ;;  %s1611_s21 = sphi %s1662_s21, %s2388_s21   ;;  %s1607_s20 = sphi %s1660_s20, %s2395_s20   ;;  %s1603_s19 = sphi %s1658_s19, %s2386_s19   ;;  %s1599_s18 = sphi %s1656_s18, %s2394_s18   ;;  %s1595_s17 = sphi %s1654_s17, %s2393_s17   ;;  %s1591_s16 = sphi %s1652_s16, %s2392_s16   ;;  %s1587_s15 = sphi %s1650_s15, %s2391_s15   ;;  %s1583_s14 = sphi %s1648_s14, %s2384_s14   ;;  %s1579_s13 = sphi %s1646_s13, %s2390_s13   ;;  %s1575_s12 = sphi %s1644_s12, %s2389_s12  }
   0xf   : > { %2344 = sst [smem:[#allocation14_spill]] %s1587_s15  ;;  %s31_s24 = sadd.s32 1, %s1607_s20 }
  0x10   : > { %2345 = sst [smem:[#allocation15_spill]] %s1603_s19  ;;  %p1701_p0 = scmp.ge.s32.totalorder %s31_s24, 2 }
  0x11   : > { %2346 = sst [smem:[#allocation16_spill]] %s1611_s21  ;;  %p49_p1 = scmp.eq.s32.totalorder %s1615_s22, 0 }
  0x12   : > { %p55_p2 = scmp.eq.s32.totalorder %s1698_s23, 0  ;;  %s67_s26 = sadd.s32 1, %s1583_s14 }
  0x13   : > { %s2397_s24 = smov (%p1701_p0, %s31_s24), 0  ;;  %p74_p3 = scmp.ne.s32.totalorder %s1583_s14, %s1579_s13 }
  0x14   : > { %2348 = sst [smem:[#allocation17_spill]] %s2397_s24  ;;  %p80_p4 = scmp.ne.s32.totalorder %s1579_s13, %s1575_s12 }
  0x15   : > { %s64_s27 = ssub.s32 %s1607_s20, %s2397_s24  ;;  %p1719_p6 = por %p74_p3, %p49_p1 }
  0x16   : > { %p65_p5 = scmp.eq.s32.totalorder %s64_s27, 0  ;;  %p1725_p7 = por %p80_p4, %p55_p2 }
  0x17   : > { %p2331_p8 = scmp.lt.s32.totalorder %s1615_s22, 4  ;;  %s179_s4 = sand.u32 1, %s1615_s22  }
  0x18   : > { %s1731_s30 = scalar_select %p65_p5, %s1583_s14, %s67_s26  }
  0x19   : > { %s181_s5 = sand.u32 1, %s1583_s14   ;;  %s1243_s7 = sshll.u32 %s1607_s20, 10 }
  0x1a   : > { %2351 = sst [smem:[#allocation18_spill]] %s1731_s30  ;;  %s1213_s6 = sshll.u32 %s181_s5, 10 }
  0x1b   : > { %s2352_s1 = sld [smem:[#allocation23_spill]]  ;;  %s183_s11 = scalar_lea.vmem [#allocation6], %s1213_s6 }
  0x1c   : > { %s191_s12 = sshll.u32 %s183_s11, 4  ;;  %p1743_p9 = pnand %p2331_p8, %p1719_p6  ;;  %s192_s12 = int_to_ptr.vmem [resolvable:$true] %s191_s12 }
  0x1d   : > { %s1216_s6 = sshll.u32 %s181_s5, 9  ;;  %s1617_s8 = smov 512  }
  0x1e   : > { %s1618_s9 = smov 32   ;;  %p1220_p10 = scmp.ge.s32.totalorder %s1615_s22, 1 }
  0x1f   : > { %s205_s28 = scalar_lea.vmem [#allocation8], %s1216_s6  ;;  %p222_p11 = scmp.lt.s32.totalorder %s1615_s22, 5 }
  0x20   : > { %s34_s5 = sadd.s32 1, %s1611_s21  ;;  %p48_p13 = scmp.ne.s32.totalorder %s1595_s17, %s1591_s16 }
  0x21   : > { %s188_s10 = scalar_lea.hbm %s2352_s1, %s1243_s7  ;;  %s1747_s7 = scalar_lea.sflag [#allocation7], %s179_s4 }
  0x22   : > { %s189_s27 = sshll.u32 %s188_s10, 4  ;;  %s1753_s10 = sshll.u32 %s205_s28, 4  ;;  %s190_s27 = int_to_ptr.hbm [resolvable:$true] %s189_s27  ;;  %s215_s10 = int_to_ptr.vmem [resolvable:$true] %s1753_s10 }
  0x23   : > { %1262 = dma.hbm_to_vmem [thread:$0]  (!%p1743_p9), %s190_s27, 16384, %s192_s12, %s1747_s7, %s1617_s8, %s1617_s8, %s1618_s9  }
  0x24   : > { %p1756_p12 = pnand %p1220_p10, %p222_p11  ;;  %s1206_s4 = sadd.s32 4294967294, %s1615_s22  }
  0x25   : > { %s41_s1 = sadd.s32 1, %s1595_s17  ;;  %s2399_s5 = smov (!%p1701_p0, %s34_s5), %s1611_s21 }
  0x26   : > { %p54_p3 = scmp.ne.s32.totalorder %s1591_s16, %s1587_s15  ;;  %p36_p4 = scmp.ge.s32.totalorder %s2399_s5, 2 }
  0x27   : > { %p130_p5 = scmp.eq.s32.totalorder %s1698_s23, 3  ;;  %p1773_p6 = por %p49_p1, %p48_p13 }
  0x28   : > { %p1779_p10 = por %p55_p2, %p54_p3  ;;  %s2401_s5 = smov (%p36_p4, %s2399_s5), 0 }
  0x29   : > { %2357 = sst [smem:[#allocation19_spill]] %s2401_s5  ;;  %p1785_p0 = por %p130_p5, %p48_p13 }
  0x2a   : > { %p136_p11 = scmp.eq.s32.totalorder %s1206_s4, 3  ;;  %s38_s6 = ssub.s32 %s1611_s21, %s2401_s5 }
  0x2b   : > { %s2358_s25 = scalar_select %p1785_p0, 1, 0 }
  0x2c   : > { %s156_s8 = sand.u32 1, %s1595_s17   ;;  %p39_p1 = scmp.eq.s32.totalorder %s38_s6, 0 }
  0x2d   : > { %2359 = sst [smem:[#allocation20_spill]] %s2358_s25  ;;  %p1792_p8 = por %p136_p11, %p54_p3 }
  0x2e   : > { %s1209_s28 = sshll.u32 %s156_s8, 6  ;;  %s1242_s30 = sshll.u32 %s1611_s21, 6 }
  0x2f   : > { %s2360_s9 = scalar_select %p1792_p8, 1, 0 }
  0x30   : > { %s1797_s24 = scalar_select %p39_p1, %s1595_s17, %s41_s1  }
  0x31   : > { %2361 = sst [smem:[#allocation21_spill]] %s2360_s9  ;;  %s166_s3 = scalar_lea.hbm %s2327_s0, %s1242_s30 }
  0x32   : > { %2362 = sst [smem:[#allocation22_spill]] %s1797_s24  ;;  %s160_s25 = scalar_lea.vmem [#allocation3], %s1209_s28 }
  0x33   : > { %s169_s4 = sshll.u32 %s160_s25, 4  ;;  %s167_s5 = sshll.u32 %s166_s3, 4  ;;  %s170_s4 = int_to_ptr.vmem [resolvable:$true] %s169_s4  ;;  %s168_s5 = int_to_ptr.hbm [resolvable:$true] %s167_s5 }
  0x34   : > { %p2363_p2 = scmp.lt.s32.totalorder %s1615_s22, 4  ;;  %s1245_s6 = sshll.u32 %s1607_s20, 9 }
  0x35   : > { %s157_s9 = scalar_lea.sflag [#allocation4], %s156_s8  ;;  %s1619_s19 = smov 256  }
  0x36   : > { %p1257_p13 = pnand %p2363_p2, %p1773_p6  ;;  %s1620_s1 = smov 16  }
  0x37   : > { %s211_s14 = scalar_lea.hbm %s2329_s2, %s1245_s6  ;;  %226 = sbr.rel (%p1756_p12) target bundleno = 485 (0x1e5), region = 32 }
  0x38   : > { %1259 = dma.hbm_to_vmem [thread:$0]  (!%p1257_p13), %s168_s5, 1024, %s170_s4, %s157_s9, %s1619_s19, %s1619_s19, %s1620_s1  }
  0x39   : > { %s212_s15 = sshll.u32 %s211_s14, 4  ;;  %s1818_s3 = sand.u32 (!%p1756_p12), 1, %s1591_s16   ;;  %s213_s15 = int_to_ptr.hbm [resolvable:$true] %s212_s15 }
  0x3a   : > { %1265 = dma.hbm_to_vmem [thread:$0]  (!%p1743_p9), %s213_s15, 8192, %s215_s10, %s1747_s7, %s1619_s19, %s1619_s19, %s1620_s1  }
  0x3b   : > { %s1221_s30 = sshll.u32 (!%p1756_p12), %s1818_s3, 6  ;;  %s229_s5 = scalar_lea.sflag (!%p1756_p12), [#allocation4], %s1818_s3 }
  0x3c   : > { %s1822_s12 = scalar_lea.vmem [#allocation3], %s1221_s30 }
  0x3d   : > { %1562 = dma.done.wait (%p1779_p10), %s229_s5, 1024  }
  0x3e   : > { %1564 = vsyncadd (%p1779_p10), %s229_s5, 4294966272  ;;  %s238_s19 = sand.u32 1, %s1698_s23   ;;  %s240_s21 = sand.u32 1, %s1579_s13  }
  0x3f   : > { %s1222_s24 = sshll.u32 %s240_s21, 10  ;;  %s239_s26 = scalar_lea.sflag [#allocation7], %s238_s19 }
  0x40   : > { %s1830_s7 = scalar_lea.vmem [#allocation6], %s1222_s24 }
  0x41   : > { %1566 = dma.done.wait (%p1725_p7), %s239_s26, 24576  }
  0x42   : > { %1568 = vsyncadd (%p1725_p7), %s239_s26, 4294942720  ;;  %s1223_s10 = sshll.u32 %s240_s21, 9  ;;  %s1838_s25 = scalar_lea.vmem [#allocation9], %s1221_s30 }
  0x43   : > { %s1836_s11 = scalar_lea.vmem [#allocation8], %s1223_s10  ;;  %p1225_p9 = scmp.ne.s32.totalorder %s1599_s18, 0 }
  0x45   : > { %292 = sbr.rel (%p1225_p9) target bundleno = 83 (0x53), region = 48 }
  0x4a   : > { %v1621_v0 = vmov 0.0  }
  0x4b   : > { %293 = vst [vmem:[#allocation2 + $0x30] sm:$0xff] %v1621_v0 }
  0x4c   : > { %294 = vst [vmem:[#allocation2] sm:$0xff] %v1621_v0 }
  0x4d   : > { %295 = vst [vmem:[#allocation2 + $0x18] sm:$0xff] %v1621_v0 }
  0x4e   : > { %296 = vst [vmem:[#allocation2 + $0x10] sm:$0xff] %v1621_v0 }
  0x4f   : > { %297 = vst [vmem:[#allocation2 + $0x8] sm:$0xff] %v1621_v0 }
  0x50   : > { %298 = vst [vmem:[#allocation2 + $0x20] sm:$0xff] %v1621_v0 }
  0x51   : > { %299 = vst [vmem:[#allocation2 + $0x28] sm:$0xff] %v1621_v0 }
  0x52   : > { %300 = vst [vmem:[#allocation2 + $0x38] sm:$0xff] %v1621_v0 }
  0x53 PF: > { %v369_v1 = vld [vmem:[%s1830_s7 + $0x1e0] sm:$0xff]  ;;  %v370_v3 = vld [vmem:[%s1830_s7 + $0x1e8] sm:$0xff]  ;;  %p1234_p7 = scmp.ne.s32.totalorder %s1599_s18, 1 }
  0x54   : > { %v433_v2 = vld [vmem:[%s1830_s7 + $0x3e0] sm:$0xff]  ;;  %437 = vmatpush.msra.mxu0 %v369_v1  ;;  %v434_v4 = vld [vmem:[%s1830_s7 + $0x3e8] sm:$0xff]  ;;  %495 = vmatpush.msra.mxu2 %v370_v3  ;;  %v372_v3 = vld [vmem:[%s1830_s7 + $0x1f8] sm:$0xff] }
  0x55   : > { %466 = vmatpush.msra.mxu1 %v433_v2  ;;  %v365_v5 = vld [vmem:[%s1830_s7 + $0x1c0] sm:$0xff]  ;;  %524 = vmatpush.msra.mxu3 %v434_v4  ;;  %v366_v7 = vld [vmem:[%s1830_s7 + $0x1c8] sm:$0xff]  ;;  %v436_v4 = vld [vmem:[%s1830_s7 + $0x3f8] sm:$0xff] }
  0x56   : > { %v429_v6 = vld [vmem:[%s1830_s7 + $0x3c0] sm:$0xff]  ;;  %v430_v8 = vld [vmem:[%s1830_s7 + $0x3c8] sm:$0xff]  ;;  %438 = vmatpush.msra.mxu0 %v365_v5  ;;  %496 = vmatpush.msra.mxu2 %v366_v7  ;;  %v371_v5 = vld [vmem:[%s1830_s7 + $0x1f0] sm:$0xff] }
  0x57   : > { %v361_v9 = vld [vmem:[%s1830_s7 + $0x1a0] sm:$0xff]  ;;  %467 = vmatpush.msra.mxu1 %v429_v6  ;;  %v362_v11 = vld [vmem:[%s1830_s7 + $0x1a8] sm:$0xff]  ;;  %525 = vmatpush.msra.mxu3 %v430_v8  ;;  %v435_v6 = vld [vmem:[%s1830_s7 + $0x3f0] sm:$0xff] }
  0x58   : > { %v425_v10 = vld [vmem:[%s1830_s7 + $0x3a0] sm:$0xff]  ;;  %v426_v12 = vld [vmem:[%s1830_s7 + $0x3a8] sm:$0xff]  ;;  %439 = vmatpush.msra.mxu0 %v361_v9  ;;  %497 = vmatpush.msra.mxu2 %v362_v11  ;;  %v368_v7 = vld [vmem:[%s1830_s7 + $0x1d8] sm:$0xff] }
  0x59   : > { %v357_v13 = vld [vmem:[%s1830_s7 + $0x180] sm:$0xff]  ;;  %468 = vmatpush.msra.mxu1 %v425_v10  ;;  %v358_v15 = vld [vmem:[%s1830_s7 + $0x188] sm:$0xff]  ;;  %526 = vmatpush.msra.mxu3 %v426_v12  ;;  %v432_v8 = vld [vmem:[%s1830_s7 + $0x3d8] sm:$0xff] }
  0x5a   : > { %v421_v14 = vld [vmem:[%s1830_s7 + $0x380] sm:$0xff]  ;;  %v422_v16 = vld [vmem:[%s1830_s7 + $0x388] sm:$0xff]  ;;  %440 = vmatpush.msra.mxu0 %v357_v13  ;;  %498 = vmatpush.msra.mxu2 %v358_v15  ;;  %v367_v9 = vld [vmem:[%s1830_s7 + $0x1d0] sm:$0xff] }
  0x5b   : > { %v353_v17 = vld [vmem:[%s1830_s7 + $0x160] sm:$0xff]  ;;  %469 = vmatpush.msra.mxu1 %v421_v14  ;;  %v354_v19 = vld [vmem:[%s1830_s7 + $0x168] sm:$0xff]  ;;  %527 = vmatpush.msra.mxu3 %v422_v16  ;;  %v431_v10 = vld [vmem:[%s1830_s7 + $0x3d0] sm:$0xff] }
  0x5c   : > { %v417_v18 = vld [vmem:[%s1830_s7 + $0x360] sm:$0xff]  ;;  %v418_v20 = vld [vmem:[%s1830_s7 + $0x368] sm:$0xff]  ;;  %441 = vmatpush.msra.mxu0 %v353_v17  ;;  %499 = vmatpush.msra.mxu2 %v354_v19  ;;  %v364_v11 = vld [vmem:[%s1830_s7 + $0x1b8] sm:$0xff] }
  0x5d   : > { %v349_v21 = vld [vmem:[%s1830_s7 + $0x140] sm:$0xff]  ;;  %470 = vmatpush.msra.mxu1 %v417_v18  ;;  %v350_v23 = vld [vmem:[%s1830_s7 + $0x148] sm:$0xff]  ;;  %528 = vmatpush.msra.mxu3 %v418_v20  ;;  %v428_v12 = vld [vmem:[%s1830_s7 + $0x3b8] sm:$0xff] }
  0x5e   : > { %v413_v22 = vld [vmem:[%s1830_s7 + $0x340] sm:$0xff]  ;;  %v414_v24 = vld [vmem:[%s1830_s7 + $0x348] sm:$0xff]  ;;  %442 = vmatpush.msra.mxu0 %v349_v21  ;;  %500 = vmatpush.msra.mxu2 %v350_v23  ;;  %v363_v13 = vld [vmem:[%s1830_s7 + $0x1b0] sm:$0xff] }
  0x5f   : > { %v345_v25 = vld [vmem:[%s1830_s7 + $0x120] sm:$0xff]  ;;  %471 = vmatpush.msra.mxu1 %v413_v22  ;;  %v346_v27 = vld [vmem:[%s1830_s7 + $0x128] sm:$0xff]  ;;  %529 = vmatpush.msra.mxu3 %v414_v24  ;;  %v427_v14 = vld [vmem:[%s1830_s7 + $0x3b0] sm:$0xff] }
  0x60   : > { %v409_v26 = vld [vmem:[%s1830_s7 + $0x320] sm:$0xff]  ;;  %v410_v28 = vld [vmem:[%s1830_s7 + $0x328] sm:$0xff]  ;;  %443 = vmatpush.msra.mxu0 %v345_v25  ;;  %501 = vmatpush.msra.mxu2 %v346_v27  ;;  %v360_v15 = vld [vmem:[%s1830_s7 + $0x198] sm:$0xff] }
  0x61   : > { %v341_v29 = vld [vmem:[%s1830_s7 + $0x100] sm:$0xff]  ;;  %472 = vmatpush.msra.mxu1 %v409_v26  ;;  %v342_v31 = vld [vmem:[%s1830_s7 + $0x108] sm:$0xff]  ;;  %530 = vmatpush.msra.mxu3 %v410_v28  ;;  %v424_v16 = vld [vmem:[%s1830_s7 + $0x398] sm:$0xff] }
  0x62   : > { %v405_v30 = vld [vmem:[%s1830_s7 + $0x300] sm:$0xff]  ;;  %v406_v32 = vld [vmem:[%s1830_s7 + $0x308] sm:$0xff]  ;;  %444 = vmatpush.msra.mxu0 %v341_v29  ;;  %502 = vmatpush.msra.mxu2 %v342_v31  ;;  %v359_v17 = vld [vmem:[%s1830_s7 + $0x190] sm:$0xff] }
  0x63   : > { %v337_v33 = vld [vmem:[%s1830_s7 + $0xe0] sm:$0xff]  ;;  %473 = vmatpush.msra.mxu1 %v405_v30  ;;  %v338_v35 = vld [vmem:[%s1830_s7 + $0xe8] sm:$0xff]  ;;  %531 = vmatpush.msra.mxu3 %v406_v32  ;;  %v423_v18 = vld [vmem:[%s1830_s7 + $0x390] sm:$0xff] }
  0x64   : > { %v401_v34 = vld [vmem:[%s1830_s7 + $0x2e0] sm:$0xff]  ;;  %v402_v36 = vld [vmem:[%s1830_s7 + $0x2e8] sm:$0xff]  ;;  %445 = vmatpush.msra.mxu0 %v337_v33  ;;  %503 = vmatpush.msra.mxu2 %v338_v35  ;;  %v1932_v19 = vld [vmem:[%s1822_s12 + $0x10] sm:$0xff] }
  0x65   : > { %v333_v37 = vld [vmem:[%s1830_s7 + $0xc0] sm:$0xff]  ;;  %474 = vmatpush.msra.mxu1 %v401_v34  ;;  %v334_v39 = vld [vmem:[%s1830_s7 + $0xc8] sm:$0xff]  ;;  %532 = vmatpush.msra.mxu3 %v402_v36  ;;  %v1935_v20 = vld [vmem:[%s1822_s12 + $0x18] sm:$0xff] }
  0x66   : > { %v397_v38 = vld [vmem:[%s1830_s7 + $0x2c0] sm:$0xff]  ;;  %v398_v40 = vld [vmem:[%s1830_s7 + $0x2c8] sm:$0xff]  ;;  %446 = vmatpush.msra.mxu0 %v333_v37  ;;  %504 = vmatpush.msra.mxu2 %v334_v39  ;;  %v356_v21 = vld [vmem:[%s1830_s7 + $0x178] sm:$0xff] }
  0x67   : > { %v329_v41 = vld [vmem:[%s1830_s7 + $0xa0] sm:$0xff]  ;;  %475 = vmatpush.msra.mxu1 %v397_v38  ;;  %v330_v43 = vld [vmem:[%s1830_s7 + $0xa8] sm:$0xff]  ;;  %533 = vmatpush.msra.mxu3 %v398_v40  ;;  %v420_v22 = vld [vmem:[%s1830_s7 + $0x378] sm:$0xff] }
  0x68   : > { %v393_v42 = vld [vmem:[%s1830_s7 + $0x2a0] sm:$0xff]  ;;  %v394_v44 = vld [vmem:[%s1830_s7 + $0x2a8] sm:$0xff]  ;;  %447 = vmatpush.msra.mxu0 %v329_v41  ;;  %505 = vmatpush.msra.mxu2 %v330_v43  ;;  %v355_v23 = vld [vmem:[%s1830_s7 + $0x170] sm:$0xff] }
  0x69   : > { %v325_v45 = vld [vmem:[%s1830_s7 + $0x80] sm:$0xff]  ;;  %476 = vmatpush.msra.mxu1 %v393_v42  ;;  %v326_v47 = vld [vmem:[%s1830_s7 + $0x88] sm:$0xff]  ;;  %534 = vmatpush.msra.mxu3 %v394_v44  ;;  %v419_v24 = vld [vmem:[%s1830_s7 + $0x370] sm:$0xff] }
  0x6a   : > { %v389_v46 = vld [vmem:[%s1830_s7 + $0x280] sm:$0xff]  ;;  %v390_v48 = vld [vmem:[%s1830_s7 + $0x288] sm:$0xff]  ;;  %448 = vmatpush.msra.mxu0 %v325_v45  ;;  %506 = vmatpush.msra.mxu2 %v326_v47  ;;  %v352_v25 = vld [vmem:[%s1830_s7 + $0x158] sm:$0xff] }
  0x6b   : > { %v321_v49 = vld [vmem:[%s1830_s7 + $0x60] sm:$0xff]  ;;  %477 = vmatpush.msra.mxu1 %v389_v46  ;;  %v322_v51 = vld [vmem:[%s1830_s7 + $0x68] sm:$0xff]  ;;  %535 = vmatpush.msra.mxu3 %v390_v48  ;;  %v416_v26 = vld [vmem:[%s1830_s7 + $0x358] sm:$0xff] }
  0x6c   : > { %v385_v50 = vld [vmem:[%s1830_s7 + $0x260] sm:$0xff]  ;;  %v386_v52 = vld [vmem:[%s1830_s7 + $0x268] sm:$0xff]  ;;  %449 = vmatpush.msra.mxu0 %v321_v49  ;;  %507 = vmatpush.msra.mxu2 %v322_v51  ;;  %v351_v27 = vld [vmem:[%s1830_s7 + $0x150] sm:$0xff] }
  0x6d   : > { %v317_v53 = vld [vmem:[%s1830_s7 + $0x40] sm:$0xff]  ;;  %478 = vmatpush.msra.mxu1 %v385_v50  ;;  %v318_v55 = vld [vmem:[%s1830_s7 + $0x48] sm:$0xff]  ;;  %536 = vmatpush.msra.mxu3 %v386_v52  ;;  %v415_v28 = vld [vmem:[%s1830_s7 + $0x350] sm:$0xff] }
  0x6e   : > { %v381_v54 = vld [vmem:[%s1830_s7 + $0x240] sm:$0xff]  ;;  %v382_v56 = vld [vmem:[%s1830_s7 + $0x248] sm:$0xff]  ;;  %450 = vmatpush.msra.mxu0 %v317_v53  ;;  %508 = vmatpush.msra.mxu2 %v318_v55  ;;  %v348_v29 = vld [vmem:[%s1830_s7 + $0x138] sm:$0xff] }
  0x6f   : > { %v313_v57 = vld [vmem:[%s1830_s7 + $0x20] sm:$0xff]  ;;  %479 = vmatpush.msra.mxu1 %v381_v54  ;;  %v314_v59 = vld [vmem:[%s1830_s7 + $0x28] sm:$0xff]  ;;  %537 = vmatpush.msra.mxu3 %v382_v56  ;;  %v412_v30 = vld [vmem:[%s1830_s7 + $0x338] sm:$0xff] }
  0x70   : > { %v377_v58 = vld [vmem:[%s1830_s7 + $0x220] sm:$0xff]  ;;  %v378_v60 = vld [vmem:[%s1830_s7 + $0x228] sm:$0xff]  ;;  %451 = vmatpush.msra.mxu0 %v313_v57  ;;  %509 = vmatpush.msra.mxu2 %v314_v59  ;;  %v347_v31 = vld [vmem:[%s1830_s7 + $0x130] sm:$0xff] }
  0x71   : > { %v309_v61 = vld [vmem:[%s1830_s7] sm:$0xff]  ;;  %480 = vmatpush.msra.mxu1 %v377_v58  ;;  %v310_v63 = vld [vmem:[%s1830_s7 + $0x8] sm:$0xff]  ;;  %538 = vmatpush.msra.mxu3 %v378_v60  ;;  %v411_v32 = vld [vmem:[%s1830_s7 + $0x330] sm:$0xff] }
  0x72   : > { %v373_v62 = vld [vmem:[%s1830_s7 + $0x200] sm:$0xff]  ;;  %v374_v0 = vld [vmem:[%s1830_s7 + $0x208] sm:$0xff]  ;;  %452 = vmatpush.msra.mxu0 %v309_v61  ;;  %510 = vmatpush.msra.mxu2 %v310_v63  ;;  %v344_v33 = vld [vmem:[%s1830_s7 + $0x118] sm:$0xff] }
  0x73   : > { %v1906_v1 = vld [vmem:[%s1822_s12] sm:$0xff]  ;;  %v1909_v2 = vld [vmem:[%s1822_s12 + $0x8] sm:$0xff]  ;;  %481 = vmatpush.msra.mxu1 %v373_v62  ;;  %539 = vmatpush.msra.mxu3 %v374_v0  ;;  %v408_v34 = vld [vmem:[%s1830_s7 + $0x318] sm:$0xff] }
  0x74   : > { %453 = vmatmul.f32.vlgmr.msra.gmra.mxu0 %v1906_v1  ;;  %482 = vmatmul.f32.vlgmr.msra.gmra.mxu1 %v1909_v2  ;;  %v343_v35 = vld [vmem:[%s1830_s7 + $0x110] sm:$0xff]  ;;  %v1958_v37 = vld [vmem:[%s1822_s12 + $0x20] sm:$0xff]  ;;  %v1961_v38 = vld [vmem:[%s1822_s12 + $0x28] sm:$0xff] }
  0x75   : > { %511 = vmatmul.f32.vlgmr.msra.gmra.mxu2 %v1906_v1  ;;  %540 = vmatmul.f32.vlgmr.msra.gmra.mxu3 %v1909_v2  ;;  %v407_v36 = vld [vmem:[%s1830_s7 + $0x310] sm:$0xff]  ;;  %v340_v39 = vld [vmem:[%s1830_s7 + $0xf8] sm:$0xff] }
  0x76   : > { %611 = vmatpush.msrb.mxu2 %v372_v3  ;;  %640 = vmatpush.msrb.mxu3 %v436_v4  ;;  %v404_v40 = vld [vmem:[%s1830_s7 + $0x2f8] sm:$0xff]  ;;  %v339_v41 = vld [vmem:[%s1830_s7 + $0xf0] sm:$0xff] }
  0x77   : > { %553 = vmatpush.msrb.mxu0 %v371_v5  ;;  %582 = vmatpush.msrb.mxu1 %v435_v6  ;;  %v403_v42 = vld [vmem:[%s1830_s7 + $0x2f0] sm:$0xff]  ;;  %v336_v43 = vld [vmem:[%s1830_s7 + $0xd8] sm:$0xff] }
  0x78   : > { %612 = vmatpush.msrb.mxu2 %v368_v7  ;;  %641 = vmatpush.msrb.mxu3 %v432_v8  ;;  %v400_v44 = vld [vmem:[%s1830_s7 + $0x2d8] sm:$0xff]  ;;  %v335_v45 = vld [vmem:[%s1830_s7 + $0xd0] sm:$0xff] }
  0x79   : > { %554 = vmatpush.msrb.mxu0 %v367_v9  ;;  %583 = vmatpush.msrb.mxu1 %v431_v10  ;;  %v399_v46 = vld [vmem:[%s1830_s7 + $0x2d0] sm:$0xff]  ;;  %v332_v47 = vld [vmem:[%s1830_s7 + $0xb8] sm:$0xff] }
  0x7a   : > { %613 = vmatpush.msrb.mxu2 %v364_v11  ;;  %642 = vmatpush.msrb.mxu3 %v428_v12  ;;  %v396_v48 = vld [vmem:[%s1830_s7 + $0x2b8] sm:$0xff]  ;;  %v331_v49 = vld [vmem:[%s1830_s7 + $0xb0] sm:$0xff]  ;;  %v873_v11 = vld [vmem:[%s1836_s11 + $0xe0] sm:$0xff] }
  0x7b   : > { %555 = vmatpush.msrb.mxu0 %v363_v13  ;;  %584 = vmatpush.msrb.mxu1 %v427_v14  ;;  %v395_v50 = vld [vmem:[%s1830_s7 + $0x2b0] sm:$0xff]  ;;  %v328_v51 = vld [vmem:[%s1830_s7 + $0x98] sm:$0xff]  ;;  %v874_v12 = vld [vmem:[%s1836_s11 + $0xe8] sm:$0xff] }
  0x7c   : > { %614 = vmatpush.msrb.mxu2 %v360_v15  ;;  %643 = vmatpush.msrb.mxu3 %v424_v16  ;;  %v392_v52 = vld [vmem:[%s1830_s7 + $0x298] sm:$0xff]  ;;  %v327_v53 = vld [vmem:[%s1830_s7 + $0x90] sm:$0xff]  ;;  %v869_v16 = vld [vmem:[%s1836_s11 + $0xc0] sm:$0xff] }
  0x7d   : > { %556 = vmatpush.msrb.mxu0 %v359_v17  ;;  %585 = vmatpush.msrb.mxu1 %v423_v18  ;;  %v391_v54 = vld [vmem:[%s1830_s7 + $0x290] sm:$0xff]  ;;  %v308_v56 = vld [vmem:[%s1822_s12 + $0x38] sm:$0xff]  ;;  %v870_v18 = vld [vmem:[%s1836_s11 + $0xc8] sm:$0xff] }
  0x7e   : > { %456 = vmatmul.f32.gmra.mxu0 %v1932_v19  ;;  %485 = vmatmul.f32.gmra.mxu1 %v1935_v20  ;;  %v307_v55 = vld [vmem:[%s1822_s12 + $0x30] sm:$0xff]  ;;  %v324_v57 = vld [vmem:[%s1830_s7 + $0x78] sm:$0xff] }
  0x7f   : > { %514 = vmatmul.f32.gmra.mxu2 %v1932_v19  ;;  %543 = vmatmul.f32.gmra.mxu3 %v1935_v20  ;;  %v388_v58 = vld [vmem:[%s1830_s7 + $0x278] sm:$0xff]  ;;  %v323_v59 = vld [vmem:[%s1830_s7 + $0x70] sm:$0xff] }
  0x80   : > { %615 = vmatpush.msrb.mxu2 %v356_v21  ;;  %644 = vmatpush.msrb.mxu3 %v420_v22  ;;  %v387_v60 = vld [vmem:[%s1830_s7 + $0x270] sm:$0xff]  ;;  %v320_v61 = vld [vmem:[%s1830_s7 + $0x58] sm:$0xff]  ;;  %v905_v21 = vld [vmem:[%s1836_s11 + $0x1e0] sm:$0xff] }
  0x81   : > { %557 = vmatpush.msrb.mxu0 %v355_v23  ;;  %586 = vmatpush.msrb.mxu1 %v419_v24  ;;  %v384_v62 = vld [vmem:[%s1830_s7 + $0x258] sm:$0xff]  ;;  %v319_v63 = vld [vmem:[%s1830_s7 + $0x50] sm:$0xff]  ;;  %v865_v24 = vld [vmem:[%s1836_s11 + $0xa0] sm:$0xff] }
  0x82   : > { %616 = vmatpush.msrb.mxu2 %v352_v25  ;;  %645 = vmatpush.msrb.mxu3 %v416_v26  ;;  %v383_v0 = vld [vmem:[%s1830_s7 + $0x250] sm:$0xff]  ;;  %v316_v3 = vld [vmem:[%s1830_s7 + $0x38] sm:$0xff]  ;;  %v866_v26 = vld [vmem:[%s1836_s11 + $0xa8] sm:$0xff] }
  0x83   : > { %558 = vmatpush.msrb.mxu0 %v351_v27  ;;  %587 = vmatpush.msrb.mxu1 %v415_v28  ;;  %v380_v4 = vld [vmem:[%s1830_s7 + $0x238] sm:$0xff]  ;;  %v315_v5 = vld [vmem:[%s1830_s7 + $0x30] sm:$0xff]  ;;  %v902_v27 = vld [vmem:[%s1836_s11 + $0x1c8] sm:$0xff] }
  0x84   : > { %617 = vmatpush.msrb.mxu2 %v348_v29  ;;  %646 = vmatpush.msrb.mxu3 %v412_v30  ;;  %v379_v6 = vld [vmem:[%s1830_s7 + $0x230] sm:$0xff]  ;;  %v312_v7 = vld [vmem:[%s1830_s7 + $0x18] sm:$0xff]  ;;  %v901_v29 = vld [vmem:[%s1836_s11 + $0x1c0] sm:$0xff] }
  0x85   : > { %559 = vmatpush.msrb.mxu0 %v347_v31  ;;  %588 = vmatpush.msrb.mxu1 %v411_v32  ;;  %v376_v8 = vld [vmem:[%s1830_s7 + $0x218] sm:$0xff]  ;;  %v311_v9 = vld [vmem:[%s1830_s7 + $0x10] sm:$0xff]  ;;  %v861_v32 = vld [vmem:[%s1836_s11 + $0x80] sm:$0xff] }
  0x86   : > { %618 = vmatpush.msrb.mxu2 %v344_v33  ;;  %647 = vmatpush.msrb.mxu3 %v408_v34  ;;  %v375_v10 = vld [vmem:[%s1830_s7 + $0x210] sm:$0xff]  ;;  %v872_v14 = vld [vmem:[%s1836_s11 + $0xd8] sm:$0xff]  ;;  %v862_v34 = vld [vmem:[%s1836_s11 + $0x88] sm:$0xff] }
  0x87   : > { %560 = vmatpush.msrb.mxu0 %v343_v35  ;;  %589 = vmatpush.msrb.mxu1 %v407_v36  ;;  %v871_v13 = vld [vmem:[%s1836_s11 + $0xd0] sm:$0xff]  ;;  %v908_v15 = vld [vmem:[%s1836_s11 + $0x1f8] sm:$0xff]  ;;  %v898_v35 = vld [vmem:[%s1836_s11 + $0x1a8] sm:$0xff] }
  0x88   : > { %459 = vmatmul.f32.gmra.mxu0 %v1958_v37  ;;  %488 = vmatmul.f32.gmra.mxu1 %v1961_v38  ;;  %v907_v17 = vld [vmem:[%s1836_s11 + $0x1f0] sm:$0xff]  ;;  %v868_v22 = vld [vmem:[%s1836_s11 + $0xb8] sm:$0xff] }
  0x89   : > { %517 = vmatmul.f32.gmra.mxu2 %v1958_v37  ;;  %546 = vmatmul.f32.gmra.mxu3 %v1961_v38  ;;  %v904_v23 = vld [vmem:[%s1836_s11 + $0x1d8] sm:$0xff]  ;;  %v903_v25 = vld [vmem:[%s1836_s11 + $0x1d0] sm:$0xff] }
  0x8a   : > { %619 = vmatpush.msrb.mxu2 %v340_v39  ;;  %648 = vmatpush.msrb.mxu3 %v404_v40  ;;  %v863_v28 = vld [vmem:[%s1836_s11 + $0x90] sm:$0xff]  ;;  %v864_v30 = vld [vmem:[%s1836_s11 + $0x98] sm:$0xff] }
  0x8b   : > { %561 = vmatpush.msrb.mxu0 %v339_v41  ;;  %590 = vmatpush.msrb.mxu1 %v403_v42  ;;  %v900_v31 = vld [vmem:[%s1836_s11 + $0x1b8] sm:$0xff]  ;;  %v899_v33 = vld [vmem:[%s1836_s11 + $0x1b0] sm:$0xff]  ;;  %v857_v42 = vld [vmem:[%s1836_s11 + $0x60] sm:$0xff] }
  0x8c   : > { %620 = vmatpush.msrb.mxu2 %v336_v43  ;;  %649 = vmatpush.msrb.mxu3 %v400_v44  ;;  %v859_v36 = vld [vmem:[%s1836_s11 + $0x70] sm:$0xff]  ;;  %v896_v41 = vld [vmem:[%s1836_s11 + $0x198] sm:$0xff] }
  0x8d   : > { %562 = vmatpush.msrb.mxu0 %v335_v45  ;;  %591 = vmatpush.msrb.mxu1 %v399_v46  ;;  %v895_v43 = vld [vmem:[%s1836_s11 + $0x190] sm:$0xff]  ;;  %v858_v45 = vld [vmem:[%s1836_s11 + $0x68] sm:$0xff] }
  0x8e   : > { %621 = vmatpush.msrb.mxu2 %v332_v47  ;;  %650 = vmatpush.msrb.mxu3 %v396_v48  ;;  %v894_v46 = vld [vmem:[%s1836_s11 + $0x188] sm:$0xff]  ;;  %v855_v47 = vld [vmem:[%s1836_s11 + $0x50] sm:$0xff]  ;;  %v893_v48 = vld [vmem:[%s1836_s11 + $0x180] sm:$0xff] }
  0x8f   : > { %563 = vmatpush.msrb.mxu0 %v331_v49  ;;  %592 = vmatpush.msrb.mxu1 %v395_v50  ;;  %v856_v50 = vld [vmem:[%s1836_s11 + $0x58] sm:$0xff] }
  0x90   : > { %622 = vmatpush.msrb.mxu2 %v328_v51  ;;  %651 = vmatpush.msrb.mxu3 %v392_v52  ;;  %v892_v51 = vld [vmem:[%s1836_s11 + $0x178] sm:$0xff]  ;;  %v853_v52 = vld [vmem:[%s1836_s11 + $0x40] sm:$0xff] }
  0x91   : > { %564 = vmatpush.msrb.mxu0 %v327_v53  ;;  %593 = vmatpush.msrb.mxu1 %v391_v54  ;;  %v891_v53 = vld [vmem:[%s1836_s11 + $0x170] sm:$0xff]  ;;  %v854_v54 = vld [vmem:[%s1836_s11 + $0x48] sm:$0xff] }
  0x92   : > { %462 = vmatmul.f32.gmra.mxu0 %v307_v55  ;;  %491 = vmatmul.f32.gmra.mxu1 %v308_v56 }
  0x93   : > { %520 = vmatmul.f32.gmra.mxu2 %v307_v55  ;;  %549 = vmatmul.f32.gmra.mxu3 %v308_v56 }
  0x94   : > { %623 = vmatpush.msrb.mxu2 %v324_v57  ;;  %652 = vmatpush.msrb.mxu3 %v388_v58  ;;  %v851_v58 = vld [vmem:[%s1836_s11 + $0x30] sm:$0xff] }
  0x95   : > { %565 = vmatpush.msrb.mxu0 %v323_v59  ;;  %594 = vmatpush.msrb.mxu1 %v387_v60  ;;  %v889_v59 = vld [vmem:[%s1836_s11 + $0x160] sm:$0xff]  ;;  %v852_v60 = vld [vmem:[%s1836_s11 + $0x38] sm:$0xff] }
  0x96   : > { %624 = vmatpush.msrb.mxu2 %v320_v61  ;;  %653 = vmatpush.msrb.mxu3 %v384_v62  ;;  %v888_v62 = vld [vmem:[%s1836_s11 + $0x158] sm:$0xff] }
  0x97   : > { %566 = vmatpush.msrb.mxu0 %v319_v63  ;;  %595 = vmatpush.msrb.mxu1 %v383_v0  ;;  %v849_v63 = vld [vmem:[%s1836_s11 + $0x20] sm:$0xff]  ;;  %v887_v0 = vld [vmem:[%s1836_s11 + $0x150] sm:$0xff] }
  0x98   : > { %625 = vmatpush.msrb.mxu2 %v316_v3  ;;  %654 = vmatpush.msrb.mxu3 %v380_v4 }
  0x99   : > { %567 = vmatpush.msrb.mxu0 %v315_v5  ;;  %596 = vmatpush.msrb.mxu1 %v379_v6  ;;  %v850_v6 = vld [vmem:[%s1836_s11 + $0x28] sm:$0xff] }
  0x9a   : > { %626 = vmatpush.msrb.mxu2 %v312_v7  ;;  %655 = vmatpush.msrb.mxu3 %v376_v8 }
  0x9b   : > { %568 = vmatpush.msrb.mxu0 %v311_v9  ;;  %597 = vmatpush.msrb.mxu1 %v375_v10  ;;  %v886_v9 = vld [vmem:[%s1836_s11 + $0x148] sm:$0xff]  ;;  %v847_v10 = vld [vmem:[%s1836_s11 + $0x10] sm:$0xff] }
  0x9c   : > { %569 = vmatmul.f32.vlgmr.msrb.gmra.mxu0 %v1906_v1  ;;  %598 = vmatmul.f32.vlgmr.msrb.gmra.mxu1 %v1909_v2 }
  0x9d   : > { %627 = vmatmul.f32.vlgmr.msrb.gmra.mxu2 %v1906_v1  ;;  %656 = vmatmul.f32.vlgmr.msrb.gmra.mxu3 %v1909_v2  ;;  %v875_v1 = vld [vmem:[%s1836_s11 + $0xf0] sm:$0xff]  ;;  %v876_v2 = vld [vmem:[%s1836_s11 + $0xf8] sm:$0xff] }
  0x9e   : > { %909 = vmatpush.msra.mxu0 %v875_v1  ;;  %967 = vmatpush.msra.mxu2 %v876_v2  ;;  %v885_v1 = vld [vmem:[%s1836_s11 + $0x140] sm:$0xff] }
  0x9f   : > { %996 = vmatpush.msra.mxu3 %v908_v15  ;;  %938 = vmatpush.msra.mxu1 %v907_v17  ;;  %v883_v15 = vld [vmem:[%s1836_s11 + $0x130] sm:$0xff]  ;;  %v882_v17 = vld [vmem:[%s1836_s11 + $0x128] sm:$0xff] }
  0xa0   : > { %910 = vmatpush.msra.mxu0 %v873_v11  ;;  %968 = vmatpush.msra.mxu2 %v874_v12  ;;  %v848_v11 = vld [vmem:[%s1836_s11 + $0x18] sm:$0xff] }
  0xa1   : > { %939 = vmatpush.msra.mxu1 %v905_v21  ;;  %v880_v21 = vld [vmem:[%s1836_s11 + $0x118] sm:$0xff] }
  0xa2   : > { %911 = vmatpush.msra.mxu0 %v871_v13  ;;  %969 = vmatpush.msra.mxu2 %v872_v14  ;;  %v884_v13 = vld [vmem:[%s1836_s11 + $0x138] sm:$0xff]  ;;  %v845_v14 = vld [vmem:[%s1836_s11] sm:$0xff] }
  0xa3   : > { %940 = vmatpush.msra.mxu1 %v903_v25 }
  0xa4   : > { %572 = vmatmul.f32.gmra.mxu0 %v1932_v19  ;;  %601 = vmatmul.f32.gmra.mxu1 %v1935_v20 }
  0xa5   : > { %630 = vmatmul.f32.gmra.mxu2 %v1932_v19  ;;  %659 = vmatmul.f32.gmra.mxu3 %v1935_v20  ;;  %v906_v19 = vld [vmem:[%s1836_s11 + $0x1e8] sm:$0xff]  ;;  %v867_v20 = vld [vmem:[%s1836_s11 + $0xb0] sm:$0xff] }
  0xa6   : > { %912 = vmatpush.msra.mxu0 %v869_v16  ;;  %970 = vmatpush.msra.mxu2 %v870_v18  ;;  %v846_v16 = vld [vmem:[%s1836_s11 + $0x8] sm:$0xff]  ;;  %v881_v18 = vld [vmem:[%s1836_s11 + $0x120] sm:$0xff] }
  0xa7   : > { %997 = vmatpush.msra.mxu3 %v906_v19  ;;  %941 = vmatpush.msra.mxu1 %v901_v29 }
  0xa8   : > { %913 = vmatpush.msra.mxu0 %v867_v20  ;;  %971 = vmatpush.msra.mxu2 %v868_v22  ;;  %v879_v22 = vld [vmem:[%s1836_s11 + $0x110] sm:$0xff] }
  0xa9   : > { %998 = vmatpush.msra.mxu3 %v904_v23  ;;  %942 = vmatpush.msra.mxu1 %v899_v33 }
  0xaa   : > { %914 = vmatpush.msra.mxu0 %v865_v24  ;;  %972 = vmatpush.msra.mxu2 %v866_v26  ;;  %v878_v26 = vld [vmem:[%s1836_s11 + $0x108] sm:$0xff] }
  0xab   : > { %999 = vmatpush.msra.mxu3 %v902_v27  ;;  %v877_v27 = vld [vmem:[%s1836_s11 + $0x100] sm:$0xff] }
  0xac   : > { %575 = vmatmul.f32.gmra.mxu0 %v1958_v37  ;;  %604 = vmatmul.f32.gmra.mxu1 %v1961_v38 }
  0xad   : > { %633 = vmatmul.f32.gmra.mxu2 %v1958_v37  ;;  %662 = vmatmul.f32.gmra.mxu3 %v1961_v38  ;;  %v897_v37 = vld [vmem:[%s1836_s11 + $0x1a0] sm:$0xff]  ;;  %v860_v38 = vld [vmem:[%s1836_s11 + $0x78] sm:$0xff] }
  0xae   : > { %915 = vmatpush.msra.mxu0 %v863_v28  ;;  %973 = vmatpush.msra.mxu2 %v864_v30 }
  0xaf   : > { %1000 = vmatpush.msra.mxu3 %v900_v31  ;;  %943 = vmatpush.msra.mxu1 %v897_v37 }
  0xb0   : > { %916 = vmatpush.msra.mxu0 %v861_v32  ;;  %974 = vmatpush.msra.mxu2 %v862_v34 }
  0xb1   : > { %1001 = vmatpush.msra.mxu3 %v898_v35  ;;  %944 = vmatpush.msra.mxu1 %v895_v43 }
  0xb2   : > { %917 = vmatpush.msra.mxu0 %v859_v36  ;;  %975 = vmatpush.msra.mxu2 %v860_v38 }
  0xb3   : > { %1002 = vmatpush.msra.mxu3 %v896_v41  ;;  %945 = vmatpush.msra.mxu1 %v893_v48 }
  0xb4   : > { %578 = vmatmul.f32.gmra.mxu0 %v307_v55  ;;  %607 = vmatmul.f32.gmra.mxu1 %v308_v56 }
  0xb5   : > { %636 = vmatmul.f32.gmra.mxu2 %v307_v55  ;;  %665 = vmatmul.f32.gmra.mxu3 %v308_v56  ;;  %v890_v55 = vld [vmem:[%s1836_s11 + $0x168] sm:$0xff] }
  0xb6   : > { %918 = vmatpush.msra.mxu0 %v857_v42  ;;  %976 = vmatpush.msra.mxu2 %v858_v45 }
  0xb7   : > { %1003 = vmatpush.msra.mxu3 %v894_v46  ;;  %946 = vmatpush.msra.mxu1 %v891_v53 }
  0xb8   : > { %919 = vmatpush.msra.mxu0 %v855_v47  ;;  %977 = vmatpush.msra.mxu2 %v856_v50 }
  0xb9   : > { %1004 = vmatpush.msra.mxu3 %v892_v51  ;;  %947 = vmatpush.msra.mxu1 %v889_v59 }
  0xba   : > { %920 = vmatpush.msra.mxu0 %v853_v52  ;;  %978 = vmatpush.msra.mxu2 %v854_v54 }
  0xbb   : > { %1005 = vmatpush.msra.mxu3 %v890_v55  ;;  %948 = vmatpush.msra.mxu1 %v887_v0 }
  0xbc   : > { %921 = vmatpush.msra.mxu0 %v851_v58  ;;  %979 = vmatpush.msra.mxu2 %v852_v60 }
  0xbd   : > { %1006 = vmatpush.msra.mxu3 %v888_v62  ;;  %949 = vmatpush.msra.mxu1 %v885_v1 }
  0xbe   : > { %922 = vmatpush.msra.mxu0 %v849_v63  ;;  %980 = vmatpush.msra.mxu2 %v850_v6 }
  0xbf   : > { %1007 = vmatpush.msra.mxu3 %v886_v9  ;;  %950 = vmatpush.msra.mxu1 %v883_v15 }
  0xc0   : > { %923 = vmatpush.msra.mxu0 %v847_v10  ;;  %981 = vmatpush.msra.mxu2 %v848_v11 }
  0xc1   : > { %1008 = vmatpush.msra.mxu3 %v884_v13  ;;  %951 = vmatpush.msra.mxu1 %v881_v18 }
  0xc2   : > { %924 = vmatpush.msra.mxu0 %v845_v14  ;;  %982 = vmatpush.msra.mxu2 %v846_v16 }
  0xc3   : > { %1009 = vmatpush.msra.mxu3 %v882_v17  ;;  %952 = vmatpush.msra.mxu1 %v879_v22 }
  0xc5   : > { %1010 = vmatpush.msra.mxu3 %v880_v21  ;;  %953 = vmatpush.msra.mxu1 %v877_v27 }
  0xc7   : > { %1011 = vmatpush.msra.mxu3 %v878_v26 }
  0xf1   : > { %v454_v39 = vpop.f32.mrf.mxu0  ;;  %v483_v40 = vpop.f32.mrf.mxu1 }
  0xf2   : > { %v2046_v44 = vadd.f32 %v483_v40, %v454_v39 }
  0xf4   : > { %v1226_v49 = vmul.f32 -1.442695, %v2046_v44 }
  0xf6   : > { %1367 = vpow2.f32 %v1226_v49 }
  0xf8   : > { %v512_v56 = vpop.f32.mrf.mxu2  ;;  %v541_v57 = vpop.f32.mrf.mxu3 }
  0xf9   : > { %v2062_v61 = vadd.f32 %v541_v57, %v512_v56 }
  0xfb   : > { %v1227_v3 = vmul.f32 -1.442695, %v2062_v61  ;;  %v457_v4 = vpop.f32.mrf.mxu0  ;;  %v486_v5 = vpop.f32.mrf.mxu1 }
  0xfc   : > { %v1368_v7 = vpop.eup %1367  ;;  %v2069_v8 = vadd.f32 %v486_v5, %v457_v4 }
  0xfd   : > { %v2074_v2 = vadd.f32 1.0, %v1368_v7  ;;  %1369 = vpow2.f32 %v1227_v3 }
  0xfe   : > { %v1228_v12 = vmul.f32 -1.442695, %v2069_v8 }
  0xff   : > { %1371 = vrcp.f32 %v2074_v2  ;;  %vm706_vm0 = vweird.f32 %v2074_v2  ;;  %v712_v54 = vand.u32 2147483648, %v2074_v2  ;;  %v710_v56 = vand.u32 2147483647, %v2074_v2 }
 0x100   : > { %1373 = vpow2.f32 %v1228_v12 }
 0x101   : > { %v713_v3 = vor.u32 1.1754944e-38, %v712_v54  ;;  %vm711_vm3 = vcmp.eq.f32.partialorder %v710_v56, 8.507059e+37 }
 0x102   : > { %v515_v19 = vpop.f32.mrf.mxu2  ;;  %v544_v20 = vpop.f32.mrf.mxu3 }
 0x103   : > { %v1370_v23 = vpop.eup %1369  ;;  %v2087_v24 = vadd.f32 %v544_v20, %v515_v19 }
 0x104   : > { %v2089_v25 = vadd.f32 1.0, %v1370_v23 }
 0x105   : > { %v1372_v28 = vpop.eup %1371  ;;  %v1229_v29 = vmul.f32 -1.442695, %v2087_v24  ;;  %v460_v30 = vpop.f32.mrf.mxu0 }
 0x106   : > { %v489_v31 = vpop.f32.mrf.mxu1  ;;  %v1374_v32 = vpop.eup %1373  ;;  %v702_v33 = vmul.f32 %v1372_v28, %v2074_v2  ;;  %1375 = vrcp.f32 %v2089_v25  ;;  %vm707_vm1 = vweird.f32 %v1372_v28  ;;  %vm721_vm4 = vweird.f32 %v2089_v25 }
 0x107   : > { %v2096_v34 = vadd.f32 1.0, %v1374_v32  ;;  %1377 = vpow2.f32 %v1229_v29  ;;  %v2098_v36 = vadd.f32 %v489_v31, %v460_v30  ;;  %vm2121_vm2 = vmor %vm706_vm0, %vm707_vm1  ;;  %v725_v11 = vand.u32 2147483647, %v2089_v25 }
 0x108   : > { %v703_v35 = vsub.f32 1.0, %v702_v33  ;;  %v727_v12 = vand.u32 2147483648, %v2089_v25 }
 0x109   : > { %1379 = vrcp.f32 %v2096_v34  ;;  %v1230_v37 = vmul.f32 -1.442695, %v2098_v36  ;;  %vm736_vm6 = vweird.f32 %v2096_v34  ;;  %v740_v14 = vand.u32 2147483647, %v2096_v34 }
 0x10a   : > { %v704_v39 = vmul.f32 %v1372_v28, %v703_v35  ;;  %v742_v15 = vand.u32 2147483648, %v2096_v34  ;;  %v728_v29 = vor.u32 1.1754944e-38, %v727_v12  ;;  %vm726_vm9 = vcmp.eq.f32.partialorder %v725_v11, 8.507059e+37 }
 0x10b   : > { %1381 = vpow2.f32 %v1230_v37  ;;  %vm2170_vm10 = vcmp.eq.f32.partialorder %v740_v14, 8.507059e+37 }
 0x10c   : > { %v2102_v38 = vpop.eup %1375  ;;  %v518_v40 = vpop.f32.mrf.mxu2  ;;  %v705_v52 = vadd.f32 %v1372_v28, %v704_v39 }
 0x10d   : > { %v547_v41 = vpop.f32.mrf.mxu3  ;;  %v1378_v42 = vpop.eup %1377  ;;  %v717_v43 = vmul.f32 %v2102_v38, %v2089_v25  ;;  %vm722_vm5 = vweird.f32 %v2102_v38 }
 0x10e   : > { %v2106_v45 = vadd.f32 %v547_v41, %v518_v40  ;;  %v2108_v46 = vadd.f32 1.0, %v1378_v42  ;;  %v709_v63 = vsel %vm2121_vm2, %v1372_v28, %v705_v52  ;;  %vm2154_vm7 = vmor %vm721_vm4, %vm722_vm5 }
 0x10f   : > { %v2110_v47 = vpop.eup %1379  ;;  %v718_v48 = vsub.f32 1.0, %v717_v43  ;;  %v463_v50 = vpop.f32.mrf.mxu0  ;;  %v714_v7 = vsel %vm711_vm3, %v713_v3, %v709_v63 }
 0x110   : > { %v1231_v49 = vmul.f32 -1.442695, %v2106_v45  ;;  %v492_v51 = vpop.f32.mrf.mxu1  ;;  %v732_v53 = vmul.f32 %v2110_v47, %v2096_v34  ;;  %1383 = vrcp.f32 %v2108_v46  ;;  %v821_v20 = vmul.f32 %v714_v7, %v2046_v44 }
 0x111   : > { %v1382_v55 = vpop.eup %1381  ;;  %v2119_v57 = vadd.f32 %v492_v51, %v463_v50  ;;  %v719_v59 = vmul.f32 %v2102_v38, %v718_v48  ;;  %vm737_vm8 = vweird.f32 %v2110_v47  ;;  %vm751_vm12 = vweird.f32 %v2108_v46 }
 0x112   : > { %1385 = vpow2.f32 %v1231_v49  ;;  %v733_v60 = vsub.f32 1.0, %v732_v53  ;;  %v2126_v62 = vadd.f32 1.0, %v1382_v55  ;;  %vm2180_vm11 = vmor %vm736_vm6, %vm737_vm8  ;;  %v755_v34 = vand.u32 2147483647, %v2108_v46 }
 0x113   : > { %v1232_v0 = vmul.f32 -1.442695, %v2119_v57  ;;  %v720_v9 = vadd.f32 %v2102_v38, %v719_v59  ;;  %v757_v42 = vand.u32 2147483648, %v2108_v46 }
 0x114   : > { %1387 = vrcp.f32 %v2126_v62  ;;  %v734_v10 = vmul.f32 %v2110_v47, %v733_v60  ;;  %vm766_vm14 = vweird.f32 %v2126_v62  ;;  %v770_v51 = vand.u32 2147483647, %v2126_v62 }
 0x115   : > { %1389 = vpow2.f32 %v1232_v0  ;;  %v724_v27 = vsel %vm2154_vm7, %v2102_v38, %v720_v9  ;;  %v743_v38 = vor.u32 1.1754944e-38, %v742_v15  ;;  %v772_v59 = vand.u32 2147483648, %v2126_v62 }
 0x116   : > { %v2132_v4 = vpop.eup %1383  ;;  %v521_v5 = vpop.f32.mrf.mxu2  ;;  %v735_v44 = vadd.f32 %v2110_v47, %v734_v10  ;;  %v729_v35 = vsel %vm726_vm9, %v728_v29, %v724_v27  ;;  %vm756_vm2 = vcmp.eq.f32.partialorder %v755_v34, 8.507059e+37  ;;  %vm771_vm3 = vcmp.eq.f32.partialorder %v770_v51, 8.507059e+37 }
 0x117   : > { %v550_v6 = vpop.f32.mrf.mxu3  ;;  %v747_v1 = vmul.f32 %v2132_v4, %v2108_v46  ;;  %vm752_vm13 = vweird.f32 %v2132_v4  ;;  %v758_v46 = vor.u32 1.1754944e-38, %v757_v42 }
 0x118   : > { %v1386_v2 = vpop.eup %1385  ;;  %v2143_v13 = vadd.f32 %v550_v6, %v521_v5  ;;  %v739_v40 = vsel %vm2180_vm11, %v2110_v47, %v735_v44  ;;  %v822_v47 = vmul.f32 %v729_v35, %v2062_v61  ;;  %vm2206_vm0 = vmor %vm751_vm12, %vm752_vm13 }
 0x119   : > { %v748_v16 = vsub.f32 1.0, %v747_v1  ;;  %v2147_v17 = vadd.f32 1.0, %v1386_v2  ;;  %v570_v18 = vpop.f32.mrf.mxu0  ;;  %v599_v19 = vpop.f32.mrf.mxu1  ;;  %v744_v56 = vsel %vm2170_vm10, %v743_v38, %v739_v40  ;;  %v773_v2 = vor.u32 1.1754944e-38, %v772_v59 }
 0x11a   : > { %v1233_v22 = vmul.f32 -1.442695, %v2143_v13  ;;  %v600_v23 = vadd.f32 %v599_v19, %v570_v18  ;;  %v2160_v26 = vpop.eup %1387  ;;  %v823_v10 = vmul.f32 %v744_v56, %v2069_v8 }
 0x11b   : > { %v749_v28 = vmul.f32 %v2132_v4, %v748_v16  ;;  %1391 = vrcp.f32 %v2147_v17  ;;  %v1390_v25 = vpop.eup %1389  ;;  %v762_v30 = vmul.f32 %v2160_v26, %v2126_v62  ;;  %vm767_vm15 = vweird.f32 %v2160_v26 }
 0x11c   : > { %1393 = vpow2.f32 %v1233_v22  ;;  %v2174_v32 = vadd.f32 1.0, %v1390_v25  ;;  %v829_v33 = vmul.f32 %v821_v20, %v600_v23  ;;  %vm2223_vm1 = vmor %vm766_vm14, %vm767_vm15  ;;  %vm781_vm4 = vweird.f32 %v2147_v17 }
 0x11d   : > { %v763_v39 = vsub.f32 1.0, %v762_v30  ;;  %v750_v41 = vadd.f32 %v2132_v4, %v749_v28  ;;  %v787_v15 = vand.u32 2147483648, %v2147_v17  ;;  %v785_v21 = vand.u32 2147483647, %v2147_v17 }
 0x11e   : > { %1395 = vrcp.f32 %v2174_v32  ;;  %925 = vmatmul.f32.vlgmr.msra.gmra.mxu0 %v829_v33  ;;  %983 = vmatmul.f32.vlgmr.msra.gmra.mxu2 %v829_v33  ;;  %vm796_vm6 = vweird.f32 %v2174_v32  ;;  %v800_v31 = vand.u32 2147483647, %v2174_v32 }
 0x11f   : > { %v764_v43 = vmul.f32 %v2160_v26, %v763_v39  ;;  %v754_v63 = vsel %vm2206_vm0, %v2132_v4, %v750_v41  ;;  %vm786_vm9 = vcmp.eq.f32.partialorder %v785_v21, 8.507059e+37  ;;  %v841_v21 = vld [vmem:[#allocation2 + $0x8] sm:$0xff] }
 0x120   : > { %v628_v48 = vpop.f32.mrf.mxu2  ;;  %v657_v49 = vpop.f32.mrf.mxu3  ;;  %v759_v1 = vsel %vm756_vm2, %v758_v46, %v754_v63  ;;  %vm801_vm11 = vcmp.eq.f32.partialorder %v800_v31, 8.507059e+37  ;;  %v837_v46 = vld [vmem:[#allocation2 + $0x30] sm:$0xff] }
 0x121   : > { %v2195_v50 = vpop.eup %1391  ;;  %v658_v52 = vadd.f32 %v657_v49, %v628_v48  ;;  %v573_v53 = vpop.f32.mrf.mxu0  ;;  %v765_v61 = vadd.f32 %v2160_v26, %v764_v43  ;;  %v824_v20 = vmul.f32 %v759_v1, %v2087_v24  ;;  %v802_v24 = vand.u32 2147483648, %v2174_v32  ;;  %v838_v1 = vld [vmem:[#allocation2] sm:$0xff] }
 0x122   : > { %v602_v54 = vpop.f32.mrf.mxu1  ;;  %v1394_v55 = vpop.eup %1393  ;;  %v777_v60 = vmul.f32 %v2195_v50, %v2147_v17  ;;  %vm782_vm5 = vweird.f32 %v2195_v50  ;;  %v788_v17 = vor.u32 1.1754944e-38, %v787_v15 }
 0x123   : > { %v2217_v0 = vadd.f32 1.0, %v1394_v55  ;;  %v830_v3 = vmul.f32 %v822_v47, %v658_v52  ;;  %v603_v5 = vadd.f32 %v602_v54, %v573_v53  ;;  %v769_v4 = vsel %vm2223_vm1, %v2160_v26, %v765_v61  ;;  %vm2245_vm7 = vmor %vm781_vm4, %vm782_vm5 }
 0x124   : > { %v778_v7 = vsub.f32 1.0, %v777_v60  ;;  %v1396_v9 = vpop.eup %1395  ;;  %v774_v12 = vsel %vm771_vm3, %v773_v2, %v769_v4  ;;  %v803_v40 = vor.u32 1.1754944e-38, %v802_v24  ;;  %v842_v24 = vld [vmem:[#allocation2 + $0x20] sm:$0xff] }
 0x125   : > { %1397 = vrcp.f32 %v2217_v0  ;;  %954 = vmatmul.f32.vlgmr.msra.gmra.mxu1 %v830_v3  ;;  %1012 = vmatmul.f32.vlgmr.msra.gmra.mxu3 %v830_v3  ;;  %v792_v11 = vmul.f32 %v1396_v9, %v2174_v32  ;;  %v831_v8 = vmul.f32 %v823_v10, %v603_v5  ;;  %vm797_vm8 = vweird.f32 %v1396_v9 }
 0x126   : > { %v779_v62 = vmul.f32 %v2195_v50, %v778_v7  ;;  %v825_v29 = vmul.f32 %v774_v12, %v2098_v36  ;;  %vm798_vm10 = vmor %vm796_vm6, %vm797_vm8  ;;  %v817_v43 = vand.u32 2147483648, %v2217_v0  ;;  %v815_v32 = vand.u32 2147483647, %v2217_v0 }
 0x127   : > { %v793_v16 = vsub.f32 1.0, %v792_v11  ;;  %928 = vmatmul.f32.gmra.mxu0 %v831_v8  ;;  %986 = vmatmul.f32.gmra.mxu2 %v831_v8  ;;  %vm811_vm13 = vweird.f32 %v2217_v0  ;;  %v839_v11 = vld [vmem:[#allocation2 + $0x18] sm:$0xff] }
 0x128   : > { %v780_v14 = vadd.f32 %v2195_v50, %v779_v62  ;;  %v631_v18 = vpop.f32.mrf.mxu2  ;;  %v660_v19 = vpop.f32.mrf.mxu3  ;;  %v818_v61 = vor.u32 1.1754944e-38, %v817_v43  ;;  %vm816_vm15 = vcmp.eq.f32.partialorder %v815_v32, 8.507059e+37 }
 0x129   : > { %v661_v22 = vadd.f32 %v660_v19, %v631_v18  ;;  %v576_v23 = vpop.f32.mrf.mxu0  ;;  %v794_v44 = vmul.f32 %v1396_v9, %v793_v16  ;;  %v840_v18 = vld [vmem:[#allocation2 + $0x10] sm:$0xff] }
 0x12a   : > { %v605_v26 = vpop.f32.mrf.mxu1  ;;  %v784_v30 = vsel %vm2245_vm7, %v2195_v50, %v780_v14 }
 0x12b   : > { %v606_v28 = vadd.f32 %v605_v26, %v576_v23  ;;  %v1398_v25 = vpop.eup %1397  ;;  %v832_v33 = vmul.f32 %v824_v20, %v661_v22  ;;  %v795_v35 = vadd.f32 %v1396_v9, %v794_v44  ;;  %v789_v39 = vsel %vm786_vm9, %v788_v17, %v784_v30  ;;  %v843_v30 = vld [vmem:[#allocation2 + $0x28] sm:$0xff] }
 0x12c   : > { %v807_v37 = vmul.f32 %v1398_v25, %v2217_v0  ;;  %vm812_vm12 = vweird.f32 %v1398_v25  ;;  %v826_v50 = vmul.f32 %v789_v39, %v2106_v45 }
 0x12d   : > { %957 = vmatmul.f32.gmra.mxu1 %v832_v33  ;;  %1015 = vmatmul.f32.gmra.mxu3 %v832_v33  ;;  %v833_v38 = vmul.f32 %v825_v29, %v606_v28  ;;  %v799_v36 = vsel %vm798_vm10, %v1396_v9, %v795_v35  ;;  %vm813_vm14 = vmor %vm811_vm13, %vm812_vm12 }
 0x12e   : > { %v808_v41 = vsub.f32 1.0, %v807_v37  ;;  %v804_v34 = vsel %vm801_vm11, %v803_v40, %v799_v36 }
 0x12f   : > { %931 = vmatmul.f32.gmra.mxu0 %v833_v38  ;;  %989 = vmatmul.f32.gmra.mxu2 %v833_v38  ;;  %v827_v55 = vmul.f32 %v804_v34, %v2119_v57  ;;  %v844_v38 = vld [vmem:[#allocation2 + $0x38] sm:$0xff] }
 0x130   : > { %v809_v42 = vmul.f32 %v1398_v25, %v808_v41  ;;  %v634_v48 = vpop.f32.mrf.mxu2  ;;  %v663_v49 = vpop.f32.mrf.mxu3 }
 0x131   : > { %v664_v47 = vadd.f32 %v663_v49, %v634_v48  ;;  %v579_v51 = vpop.f32.mrf.mxu0 }
 0x132   : > { %v608_v52 = vpop.f32.mrf.mxu1  ;;  %v810_v53 = vadd.f32 %v1398_v25, %v809_v42 }
 0x133   : > { %v609_v54 = vadd.f32 %v608_v52, %v579_v51  ;;  %v834_v56 = vmul.f32 %v826_v50, %v664_v47 }
 0x134   : > { %v814_v58 = vsel %vm813_vm14, %v1398_v25, %v810_v53 }
 0x135   : > { %960 = vmatmul.f32.gmra.mxu1 %v834_v56  ;;  %1018 = vmatmul.f32.gmra.mxu3 %v834_v56  ;;  %v835_v45 = vmul.f32 %v827_v55, %v609_v54  ;;  %v819_v59 = vsel %vm816_vm15, %v818_v61, %v814_v58 }
 0x136   : > { %v828_v3 = vmul.f32 %v819_v59, %v2143_v13 }
 0x137   : > { %934 = vmatmul.f32.gmra.mxu0 %v835_v45  ;;  %992 = vmatmul.f32.gmra.mxu2 %v835_v45 }
 0x138   : > { %v637_v60 = vpop.f32.mrf.mxu2  ;;  %v666_v63 = vpop.f32.mrf.mxu3 }
 0x139   : > { %v667_v0 = vadd.f32 %v666_v63, %v637_v60 }
 0x13b   : > { %v836_v5 = vmul.f32 %v828_v3, %v667_v0 }
 0x13d   : > { %963 = vmatmul.f32.gmra.mxu1 %v836_v5  ;;  %1021 = vmatmul.f32.gmra.mxu3 %v836_v5 }
 0x19b   : > { %v926_v57 = vpop.f32.mrf.mxu0 }
 0x1a1   : > { %v984_v7 = vpop.f32.mrf.mxu2 }
 0x1a2   : > { %v955_v6 = vpop.f32.mrf.mxu1 }
 0x1a3   : > { %v956_v9 = vadd.f32 %v955_v6, %v926_v57 }
 0x1a4   : > { %v929_v4 = vpop.f32.mrf.mxu0 }
 0x1a5   : > { %v1025_v10 = vadd.f32 %v956_v9, %v837_v46 }
 0x1a7   : > { %1033 = vst [vmem:[#allocation2 + $0x30] sm:$0xff] %v1025_v10 }
 0x1a8   : > { %v1013_v2 = vpop.f32.mrf.mxu3 }
 0x1a9   : > { %v1014_v62 = vadd.f32 %v1013_v2, %v984_v7 }
 0x1aa   : > { %v958_v8 = vpop.f32.mrf.mxu1  ;;  %v987_v14 = vpop.f32.mrf.mxu2 }
 0x1ab   : > { %v1026_v13 = vadd.f32 %v1014_v62, %v838_v1  ;;  %v959_v12 = vadd.f32 %v958_v8, %v929_v4 }
 0x1ac   : > { %v932_v16 = vpop.f32.mrf.mxu0 }
 0x1ad   : > { %1034 = vst [vmem:[#allocation2] sm:$0xff] %v1026_v13  ;;  %v1027_v15 = vadd.f32 %v959_v12, %v839_v11 }
 0x1af   : > { %1035 = vst [vmem:[#allocation2 + $0x18] sm:$0xff] %v1027_v15 }
 0x1b0   : > { %v1016_v19 = vpop.f32.mrf.mxu3 }
 0x1b1   : > { %v1017_v20 = vadd.f32 %v1016_v19, %v987_v14 }
 0x1b2   : > { %v961_v22 = vpop.f32.mrf.mxu1  ;;  %v990_v44 = vpop.f32.mrf.mxu2 }
 0x1b3   : > { %v1028_v23 = vadd.f32 %v1017_v20, %v840_v18  ;;  %v962_v26 = vadd.f32 %v961_v22, %v932_v16 }
 0x1b4   : > { %v935_v29 = vpop.f32.mrf.mxu0 }
 0x1b5   : > { %1036 = vst [vmem:[#allocation2 + $0x10] sm:$0xff] %v1028_v23  ;;  %v1029_v27 = vadd.f32 %v962_v26, %v841_v21 }
 0x1b7   : > { %1037 = vst [vmem:[#allocation2 + $0x8] sm:$0xff] %v1029_v27 }
 0x1b8   : > { %v1019_v28 = vpop.f32.mrf.mxu3 }
 0x1b9   : > { %v1020_v25 = vadd.f32 %v1019_v28, %v990_v44 }
 0x1ba   : > { %v964_v31 = vpop.f32.mrf.mxu1  ;;  %v993_v37 = vpop.f32.mrf.mxu2 }
 0x1bb   : > { %v1030_v33 = vadd.f32 %v1020_v25, %v842_v24  ;;  %v965_v17 = vadd.f32 %v964_v31, %v935_v29 }
 0x1bd   : > { %1038 = vst [vmem:[#allocation2 + $0x20] sm:$0xff] %v1030_v33  ;;  %v1031_v35 = vadd.f32 %v965_v17, %v843_v30 }
 0x1bf   : > { %1039 = vst [vmem:[#allocation2 + $0x28] sm:$0xff] %v1031_v35 }
 0x1c0   : > { %v1022_v39 = vpop.f32.mrf.mxu3 }
 0x1c1   : > { %v1023_v36 = vadd.f32 %v1022_v39, %v993_v37  ;;  %1044 = sbr.rel (%p1234_p7) target bundleno = 463 (0x1cf), region = 52 }
 0x1c3   : > { %v1032_v40 = vadd.f32 %v1023_v36, %v844_v38 }
 0x1c5   : > { %1040 = vst [vmem:[#allocation2 + $0x38] sm:$0xff] %v1032_v40 }
 0x1c6   : > { %v1045_v41 = vld [vmem:[#allocation2 + $0x30] sm:$0xff]  ;;  %v1046_v34 = vld [vmem:[#allocation2] sm:$0xff]  ;;  %v1047_v42 = vld [vmem:[#allocation2 + $0x18] sm:$0xff] }
 0x1c7   : > { %1053 = vst [vmem:[%s1838_s25] sm:$0xff] %v1045_v41  ;;  %v1048_v43 = vld [vmem:[#allocation2 + $0x10] sm:$0xff]  ;;  %v1049_v48 = vld [vmem:[#allocation2 + $0x8] sm:$0xff]  ;;  %v1050_v49 = vld [vmem:[#allocation2 + $0x20] sm:$0xff] }
 0x1c8   : > { %1054 = vst [vmem:[%s1838_s25 + $0x8] sm:$0xff] %v1046_v34  ;;  %v1051_v50 = vld [vmem:[#allocation2 + $0x28] sm:$0xff] }
 0x1c9   : > { %1055 = vst [vmem:[%s1838_s25 + $0x10] sm:$0xff] %v1047_v42 }
 0x1ca   : > { %1056 = vst [vmem:[%s1838_s25 + $0x18] sm:$0xff] %v1048_v43 }
 0x1cb   : > { %1057 = vst [vmem:[%s1838_s25 + $0x20] sm:$0xff] %v1049_v48 }
 0x1cc   : > { %v1052_v32 = vld [vmem:[#allocation2 + $0x38] sm:$0xff]  ;;  %1058 = vst [vmem:[%s1838_s25 + $0x28] sm:$0xff] %v1050_v49 }
 0x1cd   : > { %1059 = vst [vmem:[%s1838_s25 + $0x30] sm:$0xff] %v1051_v50 }
 0x1ce   : > { %1060 = vst [vmem:[%s1838_s25 + $0x38] sm:$0xff] %v1052_v32 }
 0x1cf PF: > { %s2378_s18 = sld [smem:[#allocation15_spill]]  ;;  %s1075_s4 = sshll.u32 %s1838_s25, 4  ;;  %s1076_s4 = int_to_ptr.vmem [resolvable:$true] %s1075_s4 }
 0x1d0   : > { %s2380_s9 = sld [smem:[#allocation24_spill]]  ;;  %s1062_s1 = scalar_lea.sflag [#allocation5], %s1818_s3 }
 0x1d5   : > { %s1247_s29 = sshll.u32 %s2378_s18, 6 }
 0x1d6   : > { %s1074_s28 = scalar_lea.hbm %s2380_s9, %s1247_s29  ;;  %s1509_s12 = scalar_lea.hbm %s2380_s9, 128 }
 0x1d7   : > { %s1077_s6 = sshll.u32 %s1074_s28, 4  ;;  %s1078_s6 = int_to_ptr.hbm [resolvable:$true] %s1077_s6 }
 0x1d8   : > { %s1503_s14 = sshra.s32 %s1078_s6, 4  ;;  %s1504_s14 = int_to_ptr.hbm [resolvable:$true] %s1503_s14 }
 0x1d9   : > { %s1505_s15 = scalar_lea.hbm %s1504_s14, 64  ;;  %p1510_p5 = scmp.lt.s32.totalorder %s1504_s14, %s2380_s9 }
 0x1da   : > { %p1506_p12 = scmp.ne.s32.totalorder %s1504_s14, %s1505_s15  ;;  %p1511_p6 = scmp.lt.s32.totalorder %s1509_s12, %s1505_s15 }
 0x1dc   : > { %p1507_p3 = pnand %p1506_p12, %p1785_p0  ;;  %p1512_p10 = por %p1511_p6, %p1510_p5 }
 0x1de   : > { %p1508_p4 = pneg %p1507_p3 }
 0x1e0   : > { %p1513_p11 = pnand %p1512_p10, %p1508_p4 }
 0x1e2   : > { %1516 = shalt.err (!%p1513_p11)
}
 0x1e3   : > { %s1622_s3 = smov 256   ;;  %s1623_s24 = smov 16  }
 0x1e4   : > { %1254 = dma.vmem_to_hbm [thread:$0]  (%p1785_p0), %s1076_s4, 1024, %s1078_s6, %s1062_s1, %s1622_s3, %s1622_s3, %s1623_s24  }
 0x1e5 PF: > { %s2381_s26 = sld [smem:[#allocation14_spill]]  ;;  %p1271_p1 = scmp.ge.s32.totalorder %s1615_s22, 2 }
 0x1e7   : > { %p1267_p2 = pnand %p1271_p1, %p1792_p8 }
 0x1e9   : > { %p1268_p13 = pneg %p1267_p2 }
 0x1eb   : > { %s1092_s10 = sand.u32 1, %s2381_s26  }
 0x1ec   : > { %s1093_s11 = scalar_lea.sflag [#allocation5], %s1092_s10 }
 0x1ed   : > { %1570 = dma.done.wait (%p1268_p13), %s1093_s11, 1024  }
 0x1ee   : > { %1572 = vsyncadd (%p1268_p13), %s1093_s11, 4294966272  ;;  %s22_s22 = sadd.s32 1, %s1615_s22   ;;  %s2383_s25 = sld [smem:[#allocation13_spill]] }
 0x1ef   : > { %p19_p9 = scmp.ge.s32.totalorder %s22_s22, 6   ;;  %s2384_s14 = sld [smem:[#allocation18_spill]] }
 0x1f0   : > { %s2385_s18 = sld [smem:[#allocation22_spill]]  ;;  %s2389_s12 = smov %s1579_s13 }
 0x1f1   : > { %s2386_s19 = sld [smem:[#allocation16_spill]]  ;;  %s2391_s15 = smov %s1591_s16 }
 0x1f2   : > { %s2387_s23 = sld [smem:[#allocation17_spill]]  ;;  %s2392_s16 = smov %s1595_s17 }
 0x1f3   : > { %s2388_s21 = sld [smem:[#allocation19_spill]] }
 0x1f4   : > { %s2390_s13 = smov %s2383_s25  ;;  %21 = sbr.rel (!%p19_p9) target bundleno = 14 (0xe), region = 109 }
 0x1f6   : > { %s2393_s17 = smov %s2385_s18  ;;  %s2394_s18 = smov %s1607_s20 }
 0x1f8   : > { %s2395_s20 = smov %s2387_s23 }
 0x1f9   :  { %1099 = vsyncpa [#allocation4], 1 }
 0x1fa   :  { %1101 = vsyncpa [#allocation4 + $0x1], 1 }
 0x1fb   :  { %1102 = vsyncpa [#allocation7], 1 }
 0x1fc   :  { %1104 = vsyncpa [#allocation7 + $0x1], 1 }
 0x1fd   :  { %1105 = vsyncpa [#allocation5], 1 }
 0x1fe   :  { %1107 = vsyncpa [#allocation5 + $0x1], 1 }

</bundles_post_ra>
